<compile_context>
chip_gen: v7x
topology: tpu7x:2x2x1
jax: 0.10.0
libtpu: 0.0.40
codegen_flags: <defaults>
</compile_context>

<pallas_src>
import functools

import jax
import jax.numpy as jnp
from jax.experimental import pallas as pl
from jax.experimental.pallas import tpu as pltpu


def _masked_nll_kernel(feat_ref, w_ref, side_ref, num_ref, den_ref,
                       acc_num_ref, acc_den_ref):
    """One grid step: a tile of rows of one chunk.

    grid = (n_chunks [parallel], tiles_per_chunk [arbitrary]).
    Per-row partial sums live in VMEM scratch; the scalar reduction and the
    (1,1,1) output store only happen at the last tile of each chunk.
    """
    t = pl.program_id(1)
    n_tiles = pl.num_programs(1)

    @pl.when(t == 0)
    def _():
        acc_num_ref[...] = jnp.zeros_like(acc_num_ref)
        acc_den_ref[...] = jnp.zeros_like(acc_den_ref)

    # --- classifier matmul: native dtype into the MXU, f32 accumulate -------
    logits = jnp.dot(feat_ref[...], w_ref[...],
                     preferred_element_type=jnp.float32)          # [tile, C]

    # --- stable log-sum-exp over the class axis (no full log-prob block) ----
    m = jnp.max(logits, axis=-1, keepdims=True)                    # [tile, 1]
    sumexp = jnp.sum(jnp.exp(logits - m), axis=-1, keepdims=True)  # [tile, 1]
    lse = m + jnp.log(sumexp)                                      # [tile, 1]

    # --- gather the label logit via one-hot compare against a lane iota -----
    side = side_ref[...]                                           # [tile, 2]
    labels = side[:, 0:1].astype(jnp.int32)                        # [tile, 1]
    msk = side[:, 1:2]                                             # [tile, 1]
    class_iota = jax.lax.broadcasted_iota(jnp.int32, logits.shape, 1)
    picked = jnp.sum(jnp.where(class_iota == labels, logits, 0.0),
                     axis=-1, keepdims=True)                       # [tile, 1]

    # --- per-row masked contributions into resident [tile,1] accumulators ---
    acc_num_ref[...] += msk * (lse - picked)
    acc_den_ref[...] += msk

    # --- per-chunk epilogue: one cross-lane reduce + one tiny store ---------
    @pl.when(t == n_tiles - 1)
    def _():
        num_ref[...] = jnp.sum(acc_num_ref[...]).reshape(1, 1, 1)
        den_ref[...] = jnp.sum(acc_den_ref[...]).reshape(1, 1, 1)


@functools.partial(jax.jit, static_argnames=("tile", "n_chunks"))
def masked_cross_entropy_loss(feats, weight, labels, mask, *, tile=256,
                              n_chunks=2):
    """feats [N, H], weight [H, C], labels [N] int, mask [N] float.

    Returns  -sum_t mask[t] * log_softmax(feats @ weight)[t, labels[t]]
             / sum_t mask[t]
    """
    N, H = feats.shape
    _, C = weight.shape

    # Pack labels + mask into a single [N, 2] f32 side input (one DMA / tile).
    # Labels fit exactly in f32 for any realistic class count (< 2^24).
    side = jnp.stack(
        [labels.reshape(N).astype(jnp.float32),
         mask.reshape(N).astype(jnp.float32)],
        axis=1,
    )

    # Pad rows up to a multiple of tile * n_chunks; padded rows carry mask=0
    # and label=0 so they contribute nothing (no partial tile is dropped).
    unit = tile * n_chunks
    n_pad = (-N) % unit
    if n_pad:
        feats = jnp.pad(feats, ((0, n_pad), (0, 0)))
        side = jnp.pad(side, ((0, n_pad), (0, 0)))
    n_total = N + n_pad
    tiles_per_chunk = n_total // unit

    itemsize = jnp.dtype(feats.dtype).itemsize
    cost = pl.CostEstimate(
        flops=2 * n_total * H * C,
        transcendentals=n_total * C,              # exp over the class axis
        bytes_accessed=(n_total * H * itemsize
                        + H * C * jnp.dtype(weight.dtype).itemsize
                        + n_total * 2 * 4
                        + 2 * n_chunks * 4),
    )

    # TODO(synk): for real vocab sizes C, tile the class axis as a second
    # reduction grid dim with an online max/LSE (flash-softmax style) and cap
    # vmem_limit_bytes so the weight block fits v7x's 64 MiB VMEM.
    num, den = pl.pallas_call(
        _masked_nll_kernel,
        out_shape=(
            jax.ShapeDtypeStruct((n_chunks, 1, 1), jnp.float32),
            jax.ShapeDtypeStruct((n_chunks, 1, 1), jnp.float32),
        ),
        grid=(n_chunks, tiles_per_chunk),
        in_specs=[
            pl.BlockSpec((tile, H),
                         lambda c, t: (c * tiles_per_chunk + t, 0)),  # rows
            pl.BlockSpec((H, C), lambda c, t: (0, 0)),                # weight
            pl.BlockSpec((tile, 2),
                         lambda c, t: (c * tiles_per_chunk + t, 0)),  # lbl+msk
        ],
        out_specs=(
            pl.BlockSpec((1, 1, 1), lambda c, t: (c, 0, 0)),  # per-chunk num
            pl.BlockSpec((1, 1, 1), lambda c, t: (c, 0, 0)),  # per-chunk den
        ),
        scratch_shapes=[
            pltpu.VMEM((tile, 1), jnp.float32),   # per-row loss accumulator
            pltpu.VMEM((tile, 1), jnp.float32),   # per-row mask accumulator
        ],
        compiler_params=pltpu.CompilerParams(
            dimension_semantics=("parallel", "arbitrary"),
        ),
        cost_estimate=cost,
    )(feats, weight, side)

    # Tiny final reduce + divide in JAX.  No guard against an all-masked batch
    # (den == 0); caller guarantees at least one unmasked token.
    return jnp.sum(num) / jnp.sum(den)


def loss_wrapper_forward(params, sent, sen_len, rel, mask, label, mask2):
    """JAX equivalent of LossWrapper.forward.

    The wrapped `Model` is synthetic here: an embedding lookup followed by a
    linear classifier.  The classifier matmul, log_softmax and the masked
    CrossEntropy reduction all run inside the Pallas kernel.
    """
    del sen_len, rel, mask  # synthetic model does not consume these
    emb = params["embedding"][sent]                 # [B, T, H]  (glue lookup)
    B, T, H = emb.shape
    feats = emb.reshape(B * T, H)
    # TODO(synk): the real `Model` also returns attention `weight`; the
    # synthetic model has no attention so it is omitted (unused by the loss).
    loss = masked_cross_entropy_loss(
        feats, params["classifier"], label.reshape(-1), mask2.reshape(-1)
    )
    return loss


if __name__ == "__main__":
    # Small deterministic setup.
    B, T, H, C, V = 2, 8, 32, 128, 50
    key = jax.random.PRNGKey(0)
    k_emb, k_w, k_sent, k_label, k_mask = jax.random.split(key, 5)

    params = {
        "embedding": jax.random.normal(k_emb, (V, H), jnp.float32) * 0.1,
        "classifier": jax.random.normal(k_w, (H, C), jnp.float32) * 0.1,
    }

    sent = jax.random.randint(k_sent, (B, T), 0, V, jnp.int32)
    sen_len = jnp.full((B,), T, jnp.int32)
    rel = jnp.zeros((B,), jnp.int32)
    mask = jnp.ones((B, T), jnp.float32)
    label = jax.random.randint(k_label, (B, T), 0, C, jnp.int32)
    # mask2: pad out the tail of the second example to exercise masking.
    mask2 = jnp.concatenate(
        [jnp.ones((1, T), jnp.float32),
         jnp.concatenate([jnp.ones((1, T - 3)), jnp.zeros((1, 3))], axis=1)],
        axis=0,
    )

    loss = loss_wrapper_forward(params, sent, sen_len, rel, mask, label, mask2)
    jax.block_until_ready(loss)

    # Pure-JAX reference check.
    feats = params["embedding"][sent].reshape(B * T, H)
    logits = feats @ params["classifier"]
    logp = jax.nn.log_softmax(logits, axis=-1)
    picked = jnp.take_along_axis(logp, label.reshape(-1, 1), axis=-1)[:, 0]
    ref = -jnp.sum(picked * mask2.reshape(-1)) / jnp.sum(mask2)
    assert jnp.allclose(loss, ref, rtol=1e-5, atol=1e-5), (loss, ref)

    print("KERNEL_OK")
</pallas_src>

<mosaic_0001>
module attributes {stable_mosaic.version = 11 : i64} {
  func.func @_masked_nll_kernel(%arg0: i32, %arg1: i32, %arg2: memref<256x32xf32, #tpu.memory_space<vmem>>, %arg3: memref<32x128xf32, #tpu.memory_space<vmem>>, %arg4: memref<256x2xf32, #tpu.memory_space<vmem>>, %arg5: memref<1x1x1xf32, #tpu.memory_space<vmem>>, %arg6: memref<1x1x1xf32, #tpu.memory_space<vmem>>, %arg7: memref<256x1xf32, #tpu.memory_space<vmem>>, %arg8: memref<256x1xf32, #tpu.memory_space<vmem>>) attributes {dimension_semantics = [#tpu.dimension_semantics<parallel>, #tpu.dimension_semantics<arbitrary>], iteration_bounds = array<i64: 2, 1>, scalar_prefetch = 0 : i64, scratch_operands = 2 : i64, tpu.core_type = #tpu.core_type<tc>, window_params = [{transform_indices = @transform_0, window_bounds = array<i64: 256, 32>}, {pipeline_mode = #tpu.pipeline_mode<synchronous>, transform_indices = @transform_1, window_bounds = array<i64: 32, 128>}, {transform_indices = @transform_2, window_bounds = array<i64: 256, 2>}, {transform_indices = @transform_3, window_bounds = array<i64: 1, 1, 1>}, {transform_indices = @transform_4, window_bounds = array<i64: 1, 1, 1>}]} {
    %c0_i32 = arith.constant 0 : i32
    %0 = arith.cmpi eq, %arg1, %c0_i32 : i32
    %1 = arith.extui %0 : i1 to i32
    %c0_i32_0 = arith.constant 0 : i32
    %2 = arith.cmpi ne, %1, %c0_i32_0 : i32
    scf.if %2 {
      %cst_20 = arith.constant 0.000000e+00 : f32
      %37 = vector.broadcast %cst_20 : f32 to vector<256x1xf32>
      %c0_21 = arith.constant 0 : index
      %c0_22 = arith.constant 0 : index
      %38 = vector.load %arg7[%c0_21, %c0_22] : memref<256x1xf32, #tpu.memory_space<vmem>>, vector<256x1xf32>
      tpu.vector_store %arg7[%c0_21, %c0_22], %37 {strides = array<i32>} : memref<256x1xf32, #tpu.memory_space<vmem>>, vector<256x1xf32>,
      %cst_23 = arith.constant 0.000000e+00 : f32
      %39 = vector.broadcast %cst_23 : f32 to vector<256x1xf32>
      %c0_24 = arith.constant 0 : index
      %c0_25 = arith.constant 0 : index
      %40 = vector.load %arg8[%c0_24, %c0_25] : memref<256x1xf32, #tpu.memory_space<vmem>>, vector<256x1xf32>
      tpu.vector_store %arg8[%c0_24, %c0_25], %39 {strides = array<i32>} : memref<256x1xf32, #tpu.memory_space<vmem>>, vector<256x1xf32>,
    } else {
    }
    %c0 = arith.constant 0 : index
    %c0_1 = arith.constant 0 : index
    %3 = vector.load %arg2[%c0, %c0_1] : memref<256x32xf32, #tpu.memory_space<vmem>>, vector<256x32xf32>
    %c0_2 = arith.constant 0 : index
    %c0_3 = arith.constant 0 : index
    %4 = vector.load %arg3[%c0_2, %c0_3] : memref<32x128xf32, #tpu.memory_space<vmem>>, vector<32x128xf32>
    %cst = arith.constant dense<0.000000e+00> : vector<256x128xf32>
    %5 = tpu.matmul %3, %4, %cst {dimension_numbers = #tpu.dot_dimension_numbers<[1], [0], [0], [1], [0, 0, 1, 1], [], []>} : vector<256x32xf32>, vector<32x128xf32>, vector<256x128xf32> -> vector<256x128xf32>
    %cst_4 = arith.constant dense<0xFF800000> : vector<256xf32>
    %6 = vector.multi_reduction <maximumf>, %5, %cst_4 [1] : vector<256x128xf32> to vector<256xf32>
    %7 = vector.shape_cast %6 : vector<256xf32> to vector<256x1xf32>
    %8 = vector.broadcast %7 : vector<256x1xf32> to vector<256x128xf32>
    %9 = arith.subf %5, %8 : vector<256x128xf32>
    %10 = math.exp %9 : vector<256x128xf32>
    %cst_5 = arith.constant dense<0.000000e+00> : vector<256xf32>
    %11 = vector.multi_reduction <add>, %10, %cst_5 [1] : vector<256x128xf32> to vector<256xf32>
    %12 = vector.shape_cast %11 : vector<256xf32> to vector<256x1xf32>
    %13 = math.log %12 : vector<256x1xf32>
    %14 = arith.addf %7, %13 : vector<256x1xf32>
    %c0_6 = arith.constant 0 : index
    %c0_7 = arith.constant 0 : index
    %15 = vector.load %arg4[%c0_6, %c0_7] : memref<256x2xf32, #tpu.memory_space<vmem>>, vector<256x2xf32>
    %16 = vector.extract_strided_slice %15 {offsets = [0, 0], sizes = [256, 1], strides = [1, 1]} : vector<256x2xf32> to vector<256x1xf32>
    %17 = arith.fptosi %16 : vector<256x1xf32> to vector<256x1xi32>
    %18 = vector.extract_strided_slice %15 {offsets = [0, 1], sizes = [256, 1], strides = [1, 1]} : vector<256x2xf32> to vector<256x1xf32>
    %19 = tpu.iota {dimensions = array<i32: 1>} : vector<256x128xi32>
    %20 = vector.broadcast %17 : vector<256x1xi32> to vector<256x128xi32>
    %21 = arith.cmpi eq, %19, %20 : vector<256x128xi32>
    %cst_8 = arith.constant 0.000000e+00 : f32
    %22 = vector.broadcast %cst_8 : f32 to vector<256x128xf32>
    %23 = arith.select %21, %5, %22 : vector<256x128xi1>, vector<256x128xf32>
    %cst_9 = arith.constant dense<0.000000e+00> : vector<256xf32>
    %24 = vector.multi_reduction <add>, %23, %cst_9 [1] : vector<256x128xf32> to vector<256xf32>
    %25 = vector.shape_cast %24 : vector<256xf32> to vector<256x1xf32>
    %c0_10 = arith.constant 0 : index
    %c0_11 = arith.constant 0 : index
    %26 = vector.load %arg7[%c0_10, %c0_11] : memref<256x1xf32, #tpu.memory_space<vmem>>, vector<256x1xf32>
    %27 = arith.subf %14, %25 : vector<256x1xf32>
    %28 = arith.mulf %18, %27 : vector<256x1xf32>
    %29 = arith.addf %26, %28 : vector<256x1xf32>
    %c0_12 = arith.constant 0 : index
    %c0_13 = arith.constant 0 : index
    %30 = vector.load %arg7[%c0_12, %c0_13] : memref<256x1xf32, #tpu.memory_space<vmem>>, vector<256x1xf32>
    tpu.vector_store %arg7[%c0_12, %c0_13], %29 {strides = array<i32>} : memref<256x1xf32, #tpu.memory_space<vmem>>, vector<256x1xf32>,
    %c0_14 = arith.constant 0 : index
    %c0_15 = arith.constant 0 : index
    %31 = vector.load %arg8[%c0_14, %c0_15] : memref<256x1xf32, #tpu.memory_space<vmem>>, vector<256x1xf32>
    %32 = arith.addf %31, %18 : vector<256x1xf32>
    %c0_16 = arith.constant 0 : index
    %c0_17 = arith.constant 0 : index
    %33 = vector.load %arg8[%c0_16, %c0_17] : memref<256x1xf32, #tpu.memory_space<vmem>>, vector<256x1xf32>
    tpu.vector_store %arg8[%c0_16, %c0_17], %32 {strides = array<i32>} : memref<256x1xf32, #tpu.memory_space<vmem>>, vector<256x1xf32>,
    %c0_i32_18 = arith.constant 0 : i32
    %34 = arith.cmpi eq, %arg1, %c0_i32_18 : i32
    %35 = arith.extui %34 : i1 to i32
    %c0_i32_19 = arith.constant 0 : i32
    %36 = arith.cmpi ne, %35, %c0_i32_19 : i32
    scf.if %36 {
      %c0_20 = arith.constant 0 : index
      %c0_21 = arith.constant 0 : index
      %37 = vector.load %arg7[%c0_20, %c0_21] : memref<256x1xf32, #tpu.memory_space<vmem>>, vector<256x1xf32>
      %38 = vector.shape_cast %37 : vector<256x1xf32> to vector<1x256x1xf32>
      %cst_22 = arith.constant dense<0.000000e+00> : vector<1xf32>
      %39 = vector.multi_reduction <add>, %38, %cst_22 [1, 2] : vector<1x256x1xf32> to vector<1xf32>
      %40 = vector.shape_cast %39 : vector<1xf32> to vector<1x1x1xf32>
      %41 = vector.extract %40[0, 0, 0] : f32 from vector<1x1x1xf32>
      %42 = vector.broadcast %41 : f32 to vector<1x1x1xf32>
      %c0_23 = arith.constant 0 : index
      %c0_24 = arith.constant 0 : index
      %c0_25 = arith.constant 0 : index
      %43 = vector.load %arg5[%c0_23, %c0_24, %c0_25] : memref<1x1x1xf32, #tpu.memory_space<vmem>>, vector<1x1x1xf32>
      tpu.vector_store %arg5[%c0_23, %c0_24, %c0_25], %42 {strides = array<i32>} : memref<1x1x1xf32, #tpu.memory_space<vmem>>, vector<1x1x1xf32>,
      %c0_26 = arith.constant 0 : index
      %c0_27 = arith.constant 0 : index
      %44 = vector.load %arg8[%c0_26, %c0_27] : memref<256x1xf32, #tpu.memory_space<vmem>>, vector<256x1xf32>
      %45 = vector.shape_cast %44 : vector<256x1xf32> to vector<1x256x1xf32>
      %cst_28 = arith.constant dense<0.000000e+00> : vector<1xf32>
      %46 = vector.multi_reduction <add>, %45, %cst_28 [1, 2] : vector<1x256x1xf32> to vector<1xf32>
      %47 = vector.shape_cast %46 : vector<1xf32> to vector<1x1x1xf32>
      %48 = vector.extract %47[0, 0, 0] : f32 from vector<1x1x1xf32>
      %49 = vector.broadcast %48 : f32 to vector<1x1x1xf32>
      %c0_29 = arith.constant 0 : index
      %c0_30 = arith.constant 0 : index
      %c0_31 = arith.constant 0 : index
      %50 = vector.load %arg6[%c0_29, %c0_30, %c0_31] : memref<1x1x1xf32, #tpu.memory_space<vmem>>, vector<1x1x1xf32>
      tpu.vector_store %arg6[%c0_29, %c0_30, %c0_31], %49 {strides = array<i32>} : memref<1x1x1xf32, #tpu.memory_space<vmem>>, vector<1x1x1xf32>,
    } else {
    }
    return
  }
  func.func @transform_0(%arg0: i32, %arg1: i32) -> (i32, i32) {
    %c1_i32 = arith.constant 1 : i32
    %0 = arith.muli %arg0, %c1_i32 : i32
    %1 = arith.addi %0, %arg1 : i32
    %c0_i32 = arith.constant 0 : i32
    %c0_i32_0 = arith.constant 0 : i32
    return %1, %c0_i32 : i32, i32
  }
  func.func @transform_1(%arg0: i32, %arg1: i32) -> (i32, i32) {
    %c0_i32 = arith.constant 0 : i32
    %c0_i32_0 = arith.constant 0 : i32
    %c0_i32_1 = arith.constant 0 : i32
    return %c0_i32, %c0_i32_0 : i32, i32
  }
  func.func @transform_2(%arg0: i32, %arg1: i32) -> (i32, i32) {
    %c1_i32 = arith.constant 1 : i32
    %0 = arith.muli %arg0, %c1_i32 : i32
    %1 = arith.addi %0, %arg1 : i32
    %c0_i32 = arith.constant 0 : i32
    %c0_i32_0 = arith.constant 0 : i32
    return %1, %c0_i32 : i32, i32
  }
  func.func @transform_3(%arg0: i32, %arg1: i32) -> (i32, i32, i32) {
    %c0_i32 = arith.constant 0 : i32
    %c0_i32_0 = arith.constant 0 : i32
    %c0_i32_1 = arith.constant 0 : i32
    return %arg0, %c0_i32, %c0_i32_0 : i32, i32, i32
  }
  func.func @transform_4(%arg0: i32, %arg1: i32) -> (i32, i32, i32) {
    %c0_i32 = arith.constant 0 : i32
    %c0_i32_0 = arith.constant 0 : i32
    %c0_i32_1 = arith.constant 0 : i32
    return %arg0, %c0_i32, %c0_i32_0 : i32, i32, i32
  }
}

</mosaic_0001>

<bundles_post_ra>
// kernel: masked_cross_entropy_loss.1
= control target key start
LH: loop header
LB: loop body
LE: loop exit
PB: predicated region body
PF: predicated region fallthrough
CT: control target
= control target key end

     0   :  { %s2567_s15 = smov 0   ;;  %s2569_s16 = smov 0   ;;  %s3703_s0 = inlined_call_operand.vmem [shape: f32[512,32], index: 0, kind: input, shape index: {}]   ;;  %s3704_s1 = inlined_call_operand.vmem [shape: f32[32,128], index: 1, kind: input, shape index: {}]   ;;  %s3705_s2 = inlined_call_operand.vmem [shape: f32[512,2], index: 2, kind: input, shape index: {}]   ;;  %s3706_s3 = inlined_call_operand.vmem [shape: f32[2,1,1], index: 3, kind: output, shape index: {0}]   ;;  %s3707_s4 = inlined_call_operand.vmem [shape: f32[2,1,1], index: 4, kind: output, shape index: {1}]  }
   0x1   :  { %s2571_s17 = smov 0  }
   0x2 LB: > { %s27_s18 = sadd.s32 1, %s2533_s16  ;;  %p2115_p0 = scmp.ge.s32.totalorder %s2537_s17, 1  ;;  %s2537_s17 = sphi %s2571_s17, %s15_s17   ;;  %s2533_s16 = sphi %s2569_s16, %s3790_s16   ;;  %s2529_s15 = sphi %s2567_s15, %s3789_s15  }
   0x3   : > { %p29_p1 = scmp.ge.s32.totalorder %s27_s18, 2  ;;  %p197_p2 = scmp.lt.s32.totalorder %s2537_s17, 3 }
   0x5   : > { %s3792_s18 = smov (%p29_p1, %s27_s18), 0  ;;  %p198_p3 = pnand %p2115_p0, %p197_p2 }
   0x7   : > { %201 = sbr.rel (%p198_p3) target bundleno = 1082 (0x43a), region = 32 }
   0xe   : > { %v354_v0 = vld [vmem:[%s3704_s1] sm:$0xff]  ;;  %v355_v1 = vld [vmem:[%s3704_s1 + $0x8] sm:$0xff]  ;;  %v356_v2 = vld [vmem:[%s3704_s1 + $0x10] sm:$0xff]  ;;  %s2116_s25 = sshll.u32 %s2529_s15, 5  ;;  %v2539_v5 = vmov 0   ;;  %vm358_vm0 = vcmask 261120  }
   0xf   : > { %v2246_v3 = vpack.c.bf16 %v355_v1, %v354_v0  ;;  %v357_v4 = vld [vmem:[%s3704_s1 + $0x18] sm:$0xff]  ;;  %p233_p4 = scmp.lt.s32.totalorder %s2116_s25, 63  ;;  %2353 = vset.pattern.permute.xlu1 %v2539_v5  ;;  %2354 = vset.pattern.permute.xlu0 %v2539_v5  ;;  %s2540_s9 = smov 127  }
  0x10   : > { %v2250_v6 = vpack.c.bf16 %v357_v4, %v356_v2  ;;  %p247_p5 = scmp.lt.s32.totalorder %s2529_s15, 1 }
  0x11   : > { %2247 = vmatprep.subr.bf16.mxu0 %v2246_v3  ;;  %2254 = vmatprep.subr.bf16.mxu1 %v2246_v3  ;;  %s3794_s25 = smov (!%p233_p4, %s2116_s25), 63 }
  0x12   : > { %2249 = vmatpush3.bf16.msra.mxu0 %v2246_v3  ;;  %2256 = vmatpush3.bf16.msra.mxu1 %v2246_v3  ;;  %s2117_s28 = sshll.u32 %s3794_s25, 3  ;;  %s3796_s15 = smov (!%p247_p5, %s2529_s15), 1 }
  0x13   : > { %2251 = vmatprep.subr.bf16.mxu0 %v2250_v6  ;;  %2255 = vmatprep.subr.bf16.mxu1 %v2250_v6  ;;  %s2603_s5 = scalar_lea.vmem %s3703_s0, %s2117_s28  ;;  %s2608_s8 = scalar_lea.vmem %s3705_s2, %s2117_s28 }
  0x14   : > { %v322_v7 = vld [vmem:[%s2603_s5] sm:$0xff]  ;;  %v323_v9 = vld [vmem:[%s2603_s5 + $0x8] sm:$0xff]  ;;  %v324_v13 = vld [vmem:[%s2603_s5 + $0x10] sm:$0xff]  ;;  %s249_s12 = scalar_lea.vmem %s3706_s3, %s3796_s15  ;;  %s252_s20 = scalar_lea.vmem %s3707_s4, %s3796_s15 }
  0x15   : > { %v338_v8 = vld [vmem:[%s2603_s5 + $0x80] sm:$0xff]  ;;  %v339_v10 = vld [vmem:[%s2603_s5 + $0x88] sm:$0xff]  ;;  %2198 = vmatprep.mubr.msk.f32.mxu0 %vm358_vm0, %v322_v7  ;;  %v340_v14 = vld [vmem:[%s2603_s5 + $0x90] sm:$0xff] }
  0x16   : > { %2253 = vmatpush3.bf16.msra.mxu0 %v2250_v6  ;;  %2257 = vmatpush3.bf16.msra.mxu1 %v2250_v6  ;;  %v2615_v11 = vld [vmem:[%s2608_s8] sm:$0xff]  ;;  %v2623_v15 = vld [vmem:[%s2608_s8 + $0x10] sm:$0xff]  ;;  %v2629_v18 = vld [vmem:[%s2608_s8 + $0x18] sm:$0xff] }
  0x17   : > { %2222 = vmatprep.mubr.msk.f32.mxu1 %vm358_vm0, %v338_v8  ;;  %v2258_v12 = vtrunc.f32 %v2615_v11  ;;  %v2262_v17 = vtrunc.f32 %v2623_v15  ;;  %v325_v19 = vld [vmem:[%s2603_s5 + $0x18] sm:$0xff]  ;;  %v326_v22 = vld [vmem:[%s2603_s5 + $0x20] sm:$0xff]  ;;  %v2264_v24 = vtrunc.f32 %v2629_v18  ;;  %v327_v26 = vld [vmem:[%s2603_s5 + $0x28] sm:$0xff] }
  0x18   : > { %v341_v20 = vld [vmem:[%s2603_s5 + $0x98] sm:$0xff]  ;;  %v342_v23 = vld [vmem:[%s2603_s5 + $0xa0] sm:$0xff]  ;;  %v343_v27 = vld [vmem:[%s2603_s5 + $0xa8] sm:$0xff] }
  0x19   : > { %2199 = vmatmul.mubr.msk.f32.vlgmr.msra.gmra.mrb[0].mxu0 %vm358_vm0, %v323_v9  ;;  %2223 = vmatmul.mubr.msk.f32.vlgmr.msra.gmra.mrb[0].mxu1 %vm358_vm0, %v339_v10  ;;  %v2259_v16 = vcvt.f32.s32 %v2258_v12  ;;  %v2263_v21 = vcvt.f32.s32 %v2262_v17  ;;  %v2639_v25 = vld [vmem:[%s2608_s8 + $0x20] sm:$0xff]  ;;  %v2265_v28 = vcvt.f32.s32 %v2264_v24  ;;  %v328_v29 = vld [vmem:[%s2603_s5 + $0x30] sm:$0xff]  ;;  %v2651_v32 = vld [vmem:[%s2608_s8 + $0x28] sm:$0xff] }
  0x1a   : > { %2201 = vmatprep.mubr.msk.f32.mxu0 %vm358_vm0, %v324_v13  ;;  %2225 = vmatprep.mubr.msk.f32.mxu1 %vm358_vm0, %v340_v14  ;;  %v344_v30 = vld [vmem:[%s2603_s5 + $0xb0] sm:$0xff]  ;;  %v2266_v31 = vtrunc.f32 %v2639_v25  ;;  %v329_v33 = vld [vmem:[%s2603_s5 + $0x38] sm:$0xff]  ;;  %v330_v36 = vld [vmem:[%s2603_s5 + $0x40] sm:$0xff]  ;;  %v2268_v38 = vtrunc.f32 %v2651_v32 }
  0x1b   : > { %1067 = vperm.xlu1 %2353, %v2259_v16   ;;  %v345_v34 = vld [vmem:[%s2603_s5 + $0xb8] sm:$0xff]  ;;  %v346_v37 = vld [vmem:[%s2603_s5 + $0xc0] sm:$0xff]  ;;  %v2663_v39 = vld [vmem:[%s2608_s8 + $0x8] sm:$0xff] }
  0x1c   : > { %v2267_v35 = vcvt.f32.s32 %v2266_v31  ;;  %v2666_v40 = vld [vmem:[%s2608_s8 + $0x30] sm:$0xff]  ;;  %v2260_v41 = vtrunc.f32 %v2663_v39  ;;  %v1012_v44 = vld [vmem:[%s2608_s8 + $0x60] sm:$0xff]  ;;  %v331_v45 = vld [vmem:[%s2603_s5 + $0x48] sm:$0xff]  ;;  %v2269_v48 = vcvt.f32.s32 %v2268_v38 }
  0x1d   : > { %2202 = vmatmul.mubr.msk.f32.gmra.mrb[2].mxu0 %vm358_vm0, %v325_v19  ;;  %2226 = vmatmul.mubr.msk.f32.gmra.mrb[2].mxu1 %vm358_vm0, %v341_v20  ;;  %v1010_v42 = vld [vmem:[%s2608_s8 + $0x50] sm:$0xff]  ;;  %v347_v46 = vld [vmem:[%s2603_s5 + $0xc8] sm:$0xff]  ;;  %v2270_v51 = vtrunc.f32 %v2666_v40  ;;  %v2681_v52 = vld [vmem:[%s2608_s8 + $0x38] sm:$0xff]  ;;  %v2282_v54 = vtrunc.f32 %v1012_v44 }
  0x1e   : > { %2204 = vmatprep.mubr.msk.f32.mxu0 %vm358_vm0, %v326_v22  ;;  %2228 = vmatprep.mubr.msk.f32.mxu1 %vm358_vm0, %v342_v23  ;;  %v2278_v43 = vtrunc.f32 %v1010_v42  ;;  %v2261_v47 = vcvt.f32.s32 %v2260_v41  ;;  %v332_v49 = vld [vmem:[%s2603_s5 + $0x50] sm:$0xff]  ;;  %v333_v56 = vld [vmem:[%s2603_s5 + $0x58] sm:$0xff]  ;;  %v334_v59 = vld [vmem:[%s2603_s5 + $0x60] sm:$0xff]  ;;  %v2272_v61 = vtrunc.f32 %v2681_v52 }
  0x1f   : > { %1073 = vperm.xlu1 %2353, %v2263_v21   ;;  %v348_v50 = vld [vmem:[%s2603_s5 + $0xd0] sm:$0xff]  ;;  %v349_v57 = vld [vmem:[%s2603_s5 + $0xd8] sm:$0xff]  ;;  %v2271_v58 = vcvt.f32.s32 %v2270_v51  ;;  %v350_v60 = vld [vmem:[%s2603_s5 + $0xe0] sm:$0xff]  ;;  %v2283_v63 = vcvt.f32.s32 %v2282_v54 }
  0x20   : > { %1070 = vperm.xlu0 %2354, %v2261_v47   ;;  %v2279_v53 = vcvt.f32.s32 %v2278_v43  ;;  %v1014_v55 = vld [vmem:[%s2608_s8 + $0x70] sm:$0xff]  ;;  %v1008_v62 = vld [vmem:[%s2608_s8 + $0x40] sm:$0xff]  ;;  %v335_v2 = vld [vmem:[%s2603_s5 + $0x68] sm:$0xff]  ;;  %v2273_v4 = vcvt.f32.s32 %v2272_v61 }
  0x21   : > { %2205 = vmatmul.mubr.msk.f32.gmra.mrb[4].mxu0 %vm358_vm0, %v327_v26  ;;  %2229 = vmatmul.mubr.msk.f32.gmra.mrb[4].mxu1 %vm358_vm0, %v343_v27  ;;  %v2286_v0 = vtrunc.f32 %v1014_v55  ;;  %v1016_v1 = vld [vmem:[%s2608_s8 + $0x80] sm:$0xff]  ;;  %v351_v3 = vld [vmem:[%s2603_s5 + $0xe8] sm:$0xff]  ;;  %v336_v5 = vld [vmem:[%s2603_s5 + $0x70] sm:$0xff]  ;;  %v2274_v7 = vtrunc.f32 %v1008_v62 }
  0x22   : > { %2207 = vmatprep.mubr.msk.f32.mxu0 %vm358_vm0, %v328_v29  ;;  %2231 = vmatprep.mubr.msk.f32.mxu1 %vm358_vm0, %v344_v30  ;;  %v352_v6 = vld [vmem:[%s2603_s5 + $0xf0] sm:$0xff]  ;;  %v1009_v8 = vld [vmem:[%s2608_s8 + $0x48] sm:$0xff]  ;;  %v2290_v10 = vtrunc.f32 %v1016_v1  ;;  %v337_v13 = vld [vmem:[%s2603_s5 + $0x78] sm:$0xff] }
  0x23   : > { %1076 = vperm.xlu1 %2353, %v2265_v28   ;;  %v2287_v9 = vcvt.f32.s32 %v2286_v0  ;;  %v1018_v12 = vld [vmem:[%s2608_s8 + $0x90] sm:$0xff]  ;;  %v353_v14 = vld [vmem:[%s2603_s5 + $0xf8] sm:$0xff]  ;;  %v2275_v16 = vcvt.f32.s32 %v2274_v7  ;;  %v2276_v17 = vtrunc.f32 %v1009_v8  ;;  %v1020_v22 = vld [vmem:[%s2608_s8 + $0xa0] sm:$0xff] }
  0x24   : > { %1097 = vperm.xlu0 %2354, %v2279_v53   ;;  %v1011_v19 = vld [vmem:[%s2608_s8 + $0x58] sm:$0xff]  ;;  %v2291_v20 = vcvt.f32.s32 %v2290_v10  ;;  %v2294_v21 = vtrunc.f32 %v1018_v12  ;;  %v1013_v26 = vld [vmem:[%s2608_s8 + $0x68] sm:$0xff]  ;;  %v2298_v28 = vtrunc.f32 %v1020_v22  ;;  %v1022_v29 = vld [vmem:[%s2608_s8 + $0xb0] sm:$0xff] }
  0x25   : > { %2208 = vmatmul.mubr.msk.f32.gmra.mrb[6].mxu0 %vm358_vm0, %v329_v33  ;;  %2232 = vmatmul.mubr.msk.f32.gmra.mrb[6].mxu1 %vm358_vm0, %v345_v34  ;;  %v2277_v23 = vcvt.f32.s32 %v2276_v17  ;;  %v2280_v24 = vtrunc.f32 %v1011_v19  ;;  %v2284_v31 = vtrunc.f32 %v1013_v26  ;;  %v1015_v33 = vld [vmem:[%s2608_s8 + $0x78] sm:$0xff]  ;;  %v1017_v41 = vld [vmem:[%s2608_s8 + $0x88] sm:$0xff]  ;;  %v1026_v44 = vld [vmem:[%s2608_s8 + $0xd0] sm:$0xff] }
  0x26   : > { %2210 = vmatprep.mubr.msk.f32.mxu0 %vm358_vm0, %v330_v36  ;;  %2234 = vmatprep.mubr.msk.f32.mxu1 %vm358_vm0, %v346_v37  ;;  %v2295_v27 = vcvt.f32.s32 %v2294_v21  ;;  %v2299_v34 = vcvt.f32.s32 %v2298_v28  ;;  %v1024_v36 = vld [vmem:[%s2608_s8 + $0xc0] sm:$0xff]  ;;  %v2288_v38 = vtrunc.f32 %v1015_v33  ;;  %v1019_v47 = vld [vmem:[%s2608_s8 + $0x98] sm:$0xff]  ;;  %v1021_v54 = vld [vmem:[%s2608_s8 + $0xa8] sm:$0xff]  ;;  %v1064_v33 = vlaneseq }
  0x27   : > { %1079 = vperm.xlu1 %2353, %v2267_v35   ;;  %v2281_v30 = vcvt.f32.s32 %v2280_v24  ;;  %v2302_v35 = vtrunc.f32 %v1022_v29  ;;  %v2285_v37 = vcvt.f32.s32 %v2284_v31  ;;  %v2306_v43 = vtrunc.f32 %v1024_v36  ;;  %v1025_v1 = vld [vmem:[%s2608_s8 + $0xc8] sm:$0xff]  ;;  %v1031_v12 = vld [vmem:[%s2608_s8 + $0xf8] sm:$0xff] }
  0x28   : > { %1103 = vperm.xlu0 %2354, %v2283_v63   ;;  %v2296_v53 = vtrunc.f32 %v1019_v47  ;;  %v1029_v8 = vld [vmem:[%s2608_s8 + $0xe8] sm:$0xff]  ;;  %v2756_v36 = vand.u32 127, %v1064_v33 }
  0x29   : > { %2211 = vmatmul.mubr.msk.f32.gmra.mrb[8].mxu0 %vm358_vm0, %v331_v45  ;;  %2235 = vmatmul.mubr.msk.f32.gmra.mrb[8].mxu1 %vm358_vm0, %v347_v46  ;;  %v2303_v42 = vcvt.f32.s32 %v2302_v35  ;;  %v2289_v45 = vcvt.f32.s32 %v2288_v38  ;;  %v2292_v46 = vtrunc.f32 %v1017_v41  ;;  %v2316_v10 = vtrunc.f32 %v1029_v8 }
  0x2a   : > { %2213 = vmatprep.mubr.msk.f32.mxu0 %vm358_vm0, %v332_v49  ;;  %2237 = vmatprep.mubr.msk.f32.mxu1 %vm358_vm0, %v348_v50  ;;  %v2310_v49 = vtrunc.f32 %v1026_v44  ;;  %v1028_v50 = vld [vmem:[%s2608_s8 + $0xe0] sm:$0xff] }
  0x2b   : > { %1082 = vperm.xlu1 %2353, %v2269_v48   ;;  %v2307_v48 = vcvt.f32.s32 %v2306_v43  ;;  %v2293_v51 = vcvt.f32.s32 %v2292_v46 }
  0x2c   : > { %1109 = vperm.xlu0 %2354, %v2287_v9   ;;  %v2311_v55 = vcvt.f32.s32 %v2310_v49 }
  0x2d   : > { %2214 = vmatmul.mubr.msk.f32.gmra.mrb[10].mxu0 %vm358_vm0, %v333_v56  ;;  %2238 = vmatmul.mubr.msk.f32.gmra.mrb[10].mxu1 %vm358_vm0, %v349_v57  ;;  %v2314_v56 = vtrunc.f32 %v1028_v50  ;;  %v1030_v57 = vld [vmem:[%s2608_s8 + $0xf0] sm:$0xff] }
  0x2e   : > { %2216 = vmatprep.mubr.msk.f32.mxu0 %vm358_vm0, %v334_v59  ;;  %2240 = vmatprep.mubr.msk.f32.mxu1 %vm358_vm0, %v350_v60  ;;  %v2300_v59 = vtrunc.f32 %v1021_v54  ;;  %v1023_v60 = vld [vmem:[%s2608_s8 + $0xb8] sm:$0xff]  ;;  %v2318_v62 = vtrunc.f32 %v1030_v57 }
  0x2f   : > { %1085 = vperm.xlu1 %2353, %v2271_v58   ;;  %v2297_v58 = vcvt.f32.s32 %v2296_v53  ;;  %v2315_v61 = vcvt.f32.s32 %v2314_v56  ;;  %v2304_v0 = vtrunc.f32 %v1023_v60 }
  0x30   : > { %1115 = vperm.xlu0 %2354, %v2291_v20   ;;  %v2301_v63 = vcvt.f32.s32 %v2300_v59 }
  0x31   : > { %2217 = vmatmul.mubr.msk.f32.gmra.mrb[12].mxu0 %vm358_vm0, %v335_v2  ;;  %2241 = vmatmul.mubr.msk.f32.gmra.mrb[12].mxu1 %vm358_vm0, %v351_v3  ;;  %v2319_v2 = vcvt.f32.s32 %v2318_v62  ;;  %v2305_v3 = vcvt.f32.s32 %v2304_v0 }
  0x32   : > { %2219 = vmatprep.mubr.msk.f32.mxu0 %vm358_vm0, %v336_v5  ;;  %2243 = vmatprep.mubr.msk.f32.mxu1 %vm358_vm0, %v352_v6  ;;  %v1027_v5 = vld [vmem:[%s2608_s8 + $0xd8] sm:$0xff] }
  0x33   : > { %1088 = vperm.xlu1 %2353, %v2273_v4   ;;  %v2308_v4 = vtrunc.f32 %v1025_v1  ;;  %v2312_v7 = vtrunc.f32 %v1027_v5 }
  0x34   : > { %1121 = vperm.xlu0 %2354, %v2295_v27  }
  0x35   : > { %2220 = vmatmul.mubr.msk.f32.gmra.mrb[14].mxu0 %vm358_vm0, %v337_v13  ;;  %2244 = vmatmul.mubr.msk.f32.gmra.mrb[14].mxu1 %vm358_vm0, %v353_v14  ;;  %v2309_v6 = vcvt.f32.s32 %v2308_v4  ;;  %v2313_v9 = vcvt.f32.s32 %v2312_v7  ;;  %v2317_v13 = vcvt.f32.s32 %v2316_v10  ;;  %v2320_v14 = vtrunc.f32 %v1031_v12 }
  0x37   : > { %1091 = vperm.xlu1 %2353, %v2275_v16   ;;  %v2321_v16 = vcvt.f32.s32 %v2320_v14 }
  0x38   : > { %1127 = vperm.xlu0 %2354, %v2299_v34  }
  0x3b   : > { %1094 = vperm.xlu1 %2353, %v2277_v23  }
  0x3c   : > { %1133 = vperm.xlu0 %2354, %v2303_v42  }
  0x3f   : > { %1100 = vperm.xlu1 %2353, %v2281_v30  }
  0x40   : > { %1139 = vperm.xlu0 %2354, %v2307_v48  }
  0x43   : > { %1106 = vperm.xlu1 %2353, %v2285_v37  }
  0x44   : > { %1145 = vperm.xlu0 %2354, %v2311_v55  }
  0x47   : > { %1112 = vperm.xlu1 %2353, %v2289_v45  }
  0x48   : > { %1151 = vperm.xlu0 %2354, %v2315_v61  }
  0x4b   : > { %1118 = vperm.xlu1 %2353, %v2293_v51  }
  0x4c   : > { %1157 = vperm.xlu0 %2354, %v2319_v2  }
  0x4f   : > { %1124 = vperm.xlu1 %2353, %v2297_v58  }
  0x53   : > { %1130 = vperm.xlu1 %2353, %v2301_v63  }
  0x57   : > { %1136 = vperm.xlu1 %2353, %v2305_v3  }
  0x5b   : > { %1142 = vperm.xlu1 %2353, %v2309_v6  }
  0x5f   : > { %1148 = vperm.xlu1 %2353, %v2313_v9  }
  0x63   : > { %1154 = vperm.xlu1 %2353, %v2317_v13  }
  0x67   : > { %1160 = vperm.xlu1 %2353, %v2321_v16  }
  0x9a   : > { %v1068_v17 = vpop.permute.xlu1 %1067 }
  0x9b   : > { %vm1162_vm3 = vcmp.eq.s32.totalorder %v2756_v36, %v1068_v17 }
  0x9e   : > { %v2730_v19 = vpop.permute.xlu1 %1073 }
  0x9f   : > { %v1071_v29 = vpop.permute.xlu0 %1070  ;;  %vm1164_vm8 = vcmp.eq.s32.totalorder %v2756_v36, %v2730_v19 }
  0xa0   : > { %vm1163_vm1 = vcmp.eq.s32.totalorder %v2756_v36, %v1071_v29 }
  0xa2   : > { %v2732_v20 = vpop.permute.xlu1 %1076 }
  0xa3   : > { %v2750_v31 = vpop.permute.xlu0 %1097  ;;  %vm1165_vm5 = vcmp.eq.s32.totalorder %v2756_v36, %v2732_v20 }
  0xa6   : > { %v2734_v21 = vpop.permute.xlu1 %1079 }
  0xa7   : > { %v2754_v35 = vpop.permute.xlu0 %1103  ;;  %vm1166_vm6 = vcmp.eq.s32.totalorder %v2756_v36, %v2734_v21 }
  0xaa   : > { %v2736_v22 = vpop.permute.xlu1 %1082 }
  0xab   : > { %v2779_v49 = vpop.permute.xlu0 %1109  ;;  %vm1167_vm11 = vcmp.eq.s32.totalorder %v2756_v36, %v2736_v22 }
  0xae   : > { %v2738_v23 = vpop.permute.xlu1 %1085 }
  0xaf   : > { %v1116_v60 = vpop.permute.xlu0 %1115  ;;  %vm1168_vm10 = vcmp.eq.s32.totalorder %v2756_v36, %v2738_v23 }
  0xb0   : > { %vm1178_vm4 = vcmp.eq.s32.totalorder %v2756_v36, %v1116_v60 }
  0xb2   : > { %v2740_v24 = vpop.permute.xlu1 %1088 }
  0xb3   : > { %vm1169_vm15 = vcmp.eq.s32.totalorder %v2756_v36, %v2740_v24 }
  0xb6   : > { %v2742_v26 = vpop.permute.xlu1 %1091 }
  0xb7   : > { %vm1170_vm12 = vcmp.eq.s32.totalorder %v2756_v36, %v2742_v26 }
  0xba   : > { %v2744_v27 = vpop.permute.xlu1 %1094 }
  0xbe   : > { %v2746_v28 = vpop.permute.xlu1 %1100 }
  0xc2   : > { %v2748_v30 = vpop.permute.xlu1 %1106 }
  0xc6   : > { %v2752_v34 = vpop.permute.xlu1 %1112 }
  0xca   : > { %v1119_v48 = vpop.permute.xlu1 %1118 }
  0xcb   : > { %vm1179_vm2 = vcmp.eq.s32.totalorder %v2756_v36, %v1119_v48 }
  0xce   : > { %v1125_v12 = vpop.permute.xlu1 %1124 }
  0xcf   : > { %vm1181_vm7 = vcmp.eq.s32.totalorder %v2756_v36, %v1125_v12 }
  0xd2   : > { %v1131_v19 = vpop.permute.xlu1 %1130 }
  0xd3   : > { %vm1183_vm13 = vcmp.eq.s32.totalorder %v2756_v36, %v1131_v19 }
  0xd6   : > { %v2876_v26 = vpop.permute.xlu1 %1136 }
  0xda   : > { %v1143_v12 = vpop.permute.xlu1 %1142 }
  0xec   : > { %v2758_v37 = vpop.f32.mrb[0].mxu0  ;;  %v2760_v38 = vpop.f32.mrb[0].mxu1 }
  0xed   : > { %714 = vmax.xlane.f32.xlu1 %v2760_v38  ;;  %682 = vmax.xlane.f32.xlu0 %v2758_v37  ;;  %v2764_v41 = vpop.f32.mrb[1].mxu0  ;;  %v2766_v42 = vpop.f32.mrb[1].mxu1  ;;  %v1195_v45 = vsel %vm1163_vm1, %v2758_v37, 0.0  ;;  %v1211_v57 = vsel %vm1179_vm2, %v2760_v38, 0.0  ;;  %vm1187_vm1 = vcmp.eq.s32.totalorder %v2756_v36, %v1143_v12 }
  0xee   : > { %v1194_v63 = vsel %vm1162_vm3, %v2764_v41, 0.0  ;;  %v1210_v4 = vsel %vm1178_vm4, %v2766_v42, 0.0  ;;  %vm1171_vm3 = vcmp.eq.s32.totalorder %v2756_v36, %v2744_v27 }
  0xf0   : > { %v2769_v43 = vpop.f32.mrb[2].mxu0  ;;  %v2771_v44 = vpop.f32.mrb[2].mxu1 }
  0xf1   : > { %v2774_v46 = vpop.f32.mrb[3].mxu1  ;;  %1228 = vadd.xlane.f32.xlu1 %v1195_v45  ;;  %680 = vmax.xlane.f32.xlu0 %v2764_v41  ;;  %v2777_v47 = vpop.f32.mrb[3].mxu0  ;;  %v1197_v16 = vsel %vm1165_vm5, %v2769_v43, 0.0  ;;  %v1213_v20 = vsel %vm1181_vm7, %v2771_v44, 0.0  ;;  %vm1172_vm7 = vcmp.eq.s32.totalorder %v2756_v36, %v2750_v31 }
  0xf2   : > { %v1196_v21 = vsel %vm1164_vm8, %v2777_v47, 0.0  ;;  %v1122_v45 = vpop.permute.xlu0 %1121  ;;  %vm1175_vm8 = vcmp.eq.s32.totalorder %v2756_v36, %v2748_v30 }
  0xf3   : > { %vm1180_vm9 = vcmp.eq.s32.totalorder %v2756_v36, %v1122_v45 }
  0xf4   : > { %v2781_v50 = vpop.f32.mrb[4].mxu0  ;;  %v2783_v51 = vpop.f32.mrb[4].mxu1  ;;  %v1212_v48 = vsel %vm1180_vm9, %v2774_v46, 0.0  ;;  %vm1174_vm9 = vcmp.eq.s32.totalorder %v2756_v36, %v2754_v35 }
  0xf5   : > { %v2785_v53 = vpop.f32.mrb[5].mxu1  ;;  %712 = vmax.xlane.f32.xlu0 %v2766_v42  ;;  %686 = vmax.xlane.f32.xlu1 %v2769_v43  ;;  %v2789_v54 = vpop.f32.mrb[5].mxu0  ;;  %v1199_v23 = vsel %vm1167_vm11, %v2781_v50, 0.0  ;;  %vm1176_vm11 = vcmp.eq.s32.totalorder %v2756_v36, %v2779_v49 }
  0xf6   : > { %v1198_v17 = vsel %vm1166_vm6, %v2789_v54, 0.0  ;;  %vm1173_vm6 = vcmp.eq.s32.totalorder %v2756_v36, %v2746_v28 }
  0xf8   : > { %v2792_v55 = vpop.f32.mrb[6].mxu0  ;;  %v2794_v56 = vpop.f32.mrb[6].mxu1 }
  0xf9   : > { %v2797_v58 = vpop.f32.mrb[7].mxu1  ;;  %1260 = vadd.xlane.f32.xlu0 %v1211_v57  ;;  %718 = vmax.xlane.f32.xlu1 %v2771_v44  ;;  %v2800_v59 = vpop.f32.mrb[7].mxu0 }
  0xfa   : > { %v1200_v57 = vsel %vm1168_vm10, %v2800_v59, 0.0  ;;  %vm1177_vm10 = vcmp.eq.s32.totalorder %v2756_v36, %v2752_v34 }
  0xfc   : > { %v2803_v61 = vpop.f32.mrb[8].mxu0  ;;  %v2805_v62 = vpop.f32.mrb[8].mxu1 }
  0xfd   : > { %v2808_v0 = vpop.f32.mrb[9].mxu1  ;;  %1226 = vadd.xlane.f32.xlu0 %v1194_v63  ;;  %684 = vmax.xlane.f32.xlu1 %v2777_v47  ;;  %v2811_v1 = vpop.f32.mrb[9].mxu0  ;;  %v1215_v63 = vsel %vm1183_vm13, %v2783_v51, 0.0  ;;  %v1219_v45 = vsel %vm1187_vm1, %v2805_v62, 0.0  ;;  %v1203_v19 = vsel %vm1171_vm3, %v2803_v61, 0.0  ;;  %vm257_vm1 = vcmask 7168  }
  0xfe   : > { %v1202_v60 = vsel %vm1170_vm12, %v2811_v1, 0.0  ;;  %vm1185_vm12 = vcmp.eq.s32.totalorder %v2756_v36, %v2876_v26 }
 0x100   : > { %v2814_v2 = vpop.f32.mrb[10].mxu0  ;;  %v2816_v3 = vpop.f32.mrb[10].mxu1 }
 0x101   : > { %v2819_v5 = vpop.f32.mrb[11].mxu1  ;;  %1258 = vadd.xlane.f32.xlu0 %v1210_v4  ;;  %690 = vmax.xlane.f32.xlu1 %v2781_v50  ;;  %v2822_v6 = vpop.f32.mrb[11].mxu0  ;;  %v1205_v27 = vsel %vm1173_vm6, %v2814_v2, 0.0 }
 0x102   : > { %v1128_v4 = vpop.permute.xlu0 %1127 }
 0x103   : > { %vm1182_vm14 = vcmp.eq.s32.totalorder %v2756_v36, %v1128_v4 }
 0x104   : > { %v2824_v7 = vpop.f32.mrb[12].mxu0  ;;  %v2826_v8 = vpop.f32.mrb[12].mxu1  ;;  %v1214_v22 = vsel %vm1182_vm14, %v2785_v53, 0.0 }
 0x105   : > { %v2828_v9 = vpop.f32.mrb[13].mxu1  ;;  %716 = vmax.xlane.f32.xlu0 %v2774_v46  ;;  %722 = vmax.xlane.f32.xlu1 %v2783_v51  ;;  %v2832_v10 = vpop.f32.mrb[13].mxu0  ;;  %v1207_v28 = vsel %vm1175_vm8, %v2824_v7, 0.0 }
 0x106   : > { %v1206_v4 = vsel %vm1174_vm9, %v2832_v10, 0.0 }
 0x108   : > { %v2838_v13 = vpop.f32.mrb[14].mxu0  ;;  %v2840_v14 = vpop.f32.mrb[14].mxu1 }
 0x109   : > { %v2844_v29 = vpop.f32.mrb[15].mxu1  ;;  %1232 = vadd.xlane.f32.xlu0 %v1197_v16  ;;  %1234 = vadd.xlane.f32.xlu1 %v1198_v17  ;;  %v2846_v33 = vpop.f32.mrb[15].mxu0  ;;  %v1201_v16 = vsel %vm1169_vm15, %v2792_v55, 0.0  ;;  %v1209_v30 = vsel %vm1177_vm10, %v2838_v13, 0.0 }
 0x10a   : > { %v1134_v17 = vpop.permute.xlu0 %1133  ;;  %v1208_v35 = vsel %vm1176_vm11, %v2846_v33, 0.0 }
 0x10b   : > { %vm1184_vm0 = vcmp.eq.s32.totalorder %v2756_v36, %v1134_v17 }
 0x10d   : > { %1264 = vadd.xlane.f32.xlu0 %v1213_v20  ;;  %694 = vmax.xlane.f32.xlu1 %v2792_v55  ;;  %v1149_v20 = vpop.permute.xlu1 %1148 }
 0x10e   : > { %vm1189_vm2 = vcmp.eq.s32.totalorder %v2756_v36, %v1149_v20  ;;  %v1140_v31 = vpop.permute.xlu0 %1139 }
 0x10f   : > { %vm1186_vm13 = vcmp.eq.s32.totalorder %v2756_v36, %v1140_v31 }
 0x111   : > { %1230 = vadd.xlane.f32.xlu0 %v1196_v21  ;;  %726 = vmax.xlane.f32.xlu1 %v2794_v56  ;;  %v1216_v21 = vsel %vm1184_vm0, %v2797_v58, 0.0  ;;  %v1155_v24 = vpop.permute.xlu1 %1154 }
 0x112   : > { %vm1191_vm4 = vcmp.eq.s32.totalorder %v2756_v36, %v1155_v24 }
 0x115   : > { %1262 = vadd.xlane.f32.xlu0 %v1212_v48  ;;  %1238 = vadd.xlane.f32.xlu1 %v1200_v57  ;;  %v1221_v48 = vsel %vm1189_vm2, %v2816_v3, 0.0  ;;  %v1161_v57 = vpop.permute.xlu1 %1160  ;;  %vm1911_vm2 = vcmask 0  }
 0x116   : > { %vm1193_vm5 = vcmp.eq.s32.totalorder %v2756_v36, %v1161_v57 }
 0x119   : > { %688 = vmax.xlane.f32.xlu0 %v2789_v54  ;;  %698 = vmax.xlane.f32.xlu1 %v2803_v61 }
 0x11d   : > { %720 = vmax.xlane.f32.xlu0 %v2785_v53  ;;  %730 = vmax.xlane.f32.xlu1 %v2805_v62 }
 0x121   : > { %1236 = vadd.xlane.f32.xlu0 %v1199_v23  ;;  %1242 = vadd.xlane.f32.xlu1 %v1202_v60  ;;  %v1223_v23 = vsel %vm1191_vm4, %v2826_v8, 0.0  ;;  %v1225_v60 = vsel %vm1193_vm5, %v2840_v14, 0.0 }
 0x125   : > { %1268 = vadd.xlane.f32.xlu0 %v1215_v63  ;;  %702 = vmax.xlane.f32.xlu1 %v2814_v2  ;;  %v1204_v63 = vsel %vm1172_vm7, %v2822_v6, 0.0 }
 0x129   : > { %1266 = vadd.xlane.f32.xlu0 %v1214_v22  ;;  %734 = vmax.xlane.f32.xlu1 %v2816_v3  ;;  %v1146_v22 = vpop.permute.xlu0 %1145 }
 0x12a   : > { %vm1188_vm14 = vcmp.eq.s32.totalorder %v2756_v36, %v1146_v22 }
 0x12b   : > { %v1220_v57 = vsel %vm1188_vm14, %v2819_v5, 0.0 }
 0x12d   : > { %692 = vmax.xlane.f32.xlu0 %v2800_v59  ;;  %706 = vmax.xlane.f32.xlu1 %v2824_v7 }
 0x131   : > { %724 = vmax.xlane.f32.xlu0 %v2797_v58  ;;  %738 = vmax.xlane.f32.xlu1 %v2826_v8 }
 0x135   : > { %1240 = vadd.xlane.f32.xlu0 %v1201_v16  ;;  %710 = vmax.xlane.f32.xlu1 %v2838_v13  ;;  %v1217_v16 = vsel %vm1185_vm12, %v2794_v56, 0.0 }
 0x139   : > { %1270 = vadd.xlane.f32.xlu0 %v1216_v21  ;;  %742 = vmax.xlane.f32.xlu1 %v2840_v14  ;;  %v1218_v21 = vsel %vm1186_vm13, %v2808_v0, 0.0 }
 0x13d   : > { %696 = vmax.xlane.f32.xlu0 %v2811_v1  ;;  %1276 = vadd.xlane.f32.xlu1 %v1219_v45 }
 0x141   : > { %728 = vmax.xlane.f32.xlu0 %v2808_v0  ;;  %1280 = vadd.xlane.f32.xlu1 %v1221_v48 }
 0x145   : > { %1244 = vadd.xlane.f32.xlu0 %v1203_v19  ;;  %1284 = vadd.xlane.f32.xlu1 %v1223_v23 }
 0x149   : > { %700 = vmax.xlane.f32.xlu0 %v2822_v6  ;;  %1288 = vadd.xlane.f32.xlu1 %v1225_v60 }
 0x14d   : > { %732 = vmax.xlane.f32.xlu0 %v2819_v5 }
 0x151   : > { %1248 = vadd.xlane.f32.xlu0 %v1205_v27 }
 0x155   : > { %1246 = vadd.xlane.f32.xlu0 %v1204_v63 }
 0x159   : > { %704 = vmax.xlane.f32.xlu0 %v2832_v10 }
 0x15a   : > { %1643 = vrot.lane.b32.xlu1 %v2615_v11, %s2540_s9  ;;  %v1152_v11 = vpop.permute.xlu0 %1151 }
 0x15b   : > { %vm1190_vm15 = vcmp.eq.s32.totalorder %v2756_v36, %v1152_v11 }
 0x15c   : > { %v1222_v23 = vsel %vm1190_vm15, %v2828_v9, 0.0 }
 0x15d   : > { %736 = vmax.xlane.f32.xlu0 %v2828_v9 }
 0x15e   : > { %v1158_v12 = vpop.permute.xlu0 %1157 }
 0x15f   : > { %vm1192_vm0 = vcmp.eq.s32.totalorder %v2756_v36, %v1158_v12 }
 0x160   : > { %v1224_v31 = vsel %vm1192_vm0, %v2844_v29, 0.0 }
 0x161   : > { %1252 = vadd.xlane.f32.xlu0 %v1207_v28 }
 0x165   : > { %1250 = vadd.xlane.f32.xlu0 %v1206_v4 }
 0x169   : > { %708 = vmax.xlane.f32.xlu0 %v2846_v33 }
 0x16d   : > { %740 = vmax.xlane.f32.xlu0 %v2844_v29 }
 0x171   : > { %1256 = vadd.xlane.f32.xlu0 %v1209_v30 }
 0x175   : > { %1254 = vadd.xlane.f32.xlu0 %v1208_v35 }
 0x179   : > { %1272 = vadd.xlane.f32.xlu0 %v1217_v16 }
 0x17a   : > { %v2931_v17 = vpop.xlane.xlu1 %714  ;;  %v2933_v34 = vpop.xlane.xlu0 %682 }
 0x17b   : > { %v745_v20 = vsub.f32 %v2758_v37, %v2933_v34  ;;  %v761_v49 = vsub.f32 %v2760_v38, %v2931_v17 }
 0x17d   : > { %v778_v45 = vmul.f32 1.442695, %v745_v20  ;;  %1274 = vadd.xlane.f32.xlu0 %v1218_v21  ;;  %v810_v48 = vmul.f32 1.442695, %v761_v49  ;;  %v2541_v21 = vmov 0.0  }
 0x17e   : > { %v2941_v26 = vpop.xlane.xlu1 %1228  ;;  %v2943_v24 = vpop.xlane.xlu0 %680  ;;  %290 = vst.msk [vmem:[#allocation3] sm:$0xff] %vm257_vm1, %v2541_v21  ;;  %258 = vst.msk [vmem:[#allocation2] sm:$0xff] %vm257_vm1, %v2541_v21 }
 0x17f   : > { %2355 = vpow2.f32 %v778_v45  ;;  %259 = vst.msk [vmem:[#allocation2 + $0x8] sm:$0xff] %vm257_vm1, %v2541_v21  ;;  %260 = vst.msk [vmem:[#allocation2 + $0x10] sm:$0xff] %vm257_vm1, %v2541_v21 }
 0x180   : > { %2357 = vpow2.f32 %v810_v48  ;;  %261 = vst.msk [vmem:[#allocation2 + $0x18] sm:$0xff] %vm257_vm1, %v2541_v21  ;;  %262 = vst.msk [vmem:[#allocation2 + $0x20] sm:$0xff] %vm257_vm1, %v2541_v21 }
 0x181   : > { %1278 = vadd.xlane.f32.xlu0 %v1220_v57  ;;  %263 = vst.msk [vmem:[#allocation2 + $0x28] sm:$0xff] %vm257_vm1, %v2541_v21  ;;  %264 = vst.msk [vmem:[#allocation2 + $0x30] sm:$0xff] %vm257_vm1, %v2541_v21 }
 0x182   : > { %v2947_v37 = vpop.xlane.xlu0 %712  ;;  %v2949_v19 = vpop.xlane.xlu1 %686  ;;  %265 = vst.msk [vmem:[#allocation2 + $0x38] sm:$0xff] %vm257_vm1, %v2541_v21  ;;  %266 = vst.msk [vmem:[#allocation2 + $0x40] sm:$0xff] %vm257_vm1, %v2541_v21 }
 0x183   : > { %v747_v38 = vsub.f32 %v2769_v43, %v2949_v19  ;;  %267 = vst.msk [vmem:[#allocation2 + $0x48] sm:$0xff] %vm257_vm1, %v2541_v21  ;;  %268 = vst.msk [vmem:[#allocation2 + $0x50] sm:$0xff] %vm257_vm1, %v2541_v21 }
 0x184   : > { %269 = vst.msk [vmem:[#allocation2 + $0x58] sm:$0xff] %vm257_vm1, %v2541_v21  ;;  %270 = vst.msk [vmem:[#allocation2 + $0x60] sm:$0xff] %vm257_vm1, %v2541_v21 }
 0x185   : > { %v782_v60 = vmul.f32 1.442695, %v747_v38  ;;  %1282 = vadd.xlane.f32.xlu0 %v1222_v23  ;;  %271 = vst.msk [vmem:[#allocation2 + $0x68] sm:$0xff] %vm257_vm1, %v2541_v21  ;;  %272 = vst.msk [vmem:[#allocation2 + $0x70] sm:$0xff] %vm257_vm1, %v2541_v21 }
 0x186   : > { %v2955_v27 = vpop.xlane.xlu0 %1260  ;;  %v2957_v63 = vpop.xlane.xlu1 %718  ;;  %273 = vst.msk [vmem:[#allocation2 + $0x78] sm:$0xff] %vm257_vm1, %v2541_v21  ;;  %274 = vst.msk [vmem:[#allocation2 + $0x80] sm:$0xff] %vm257_vm1, %v2541_v21 }
 0x187   : > { %v763_v28 = vsub.f32 %v2771_v44, %v2957_v63  ;;  %2359 = vpow2.f32 %v782_v60  ;;  %275 = vst.msk [vmem:[#allocation2 + $0x88] sm:$0xff] %vm257_vm1, %v2541_v21  ;;  %276 = vst.msk [vmem:[#allocation2 + $0x90] sm:$0xff] %vm257_vm1, %v2541_v21 }
 0x188   : > { %277 = vst.msk [vmem:[#allocation2 + $0x98] sm:$0xff] %vm257_vm1, %v2541_v21  ;;  %278 = vst.msk [vmem:[#allocation2 + $0xa0] sm:$0xff] %vm257_vm1, %v2541_v21 }
 0x189   : > { %v814_v4 = vmul.f32 1.442695, %v763_v28  ;;  %1286 = vadd.xlane.f32.xlu0 %v1224_v31  ;;  %v2356_v43 = vpop.eup %2355  ;;  %279 = vst.msk [vmem:[#allocation2 + $0xa8] sm:$0xff] %vm257_vm1, %v2541_v21  ;;  %280 = vst.msk [vmem:[#allocation2 + $0xb0] sm:$0xff] %vm257_vm1, %v2541_v21 }
 0x18a   : > { %v2963_v22 = vpop.xlane.xlu0 %1226  ;;  %v2965_v11 = vpop.xlane.xlu1 %684  ;;  %842 = vadd.xlane.f32.xlu1 %v2356_v43  ;;  %281 = vst.msk [vmem:[#allocation2 + $0xb8] sm:$0xff] %vm257_vm1, %v2541_v21  ;;  %282 = vst.msk [vmem:[#allocation2 + $0xc0] sm:$0xff] %vm257_vm1, %v2541_v21 }
 0x18b   : > { %2361 = vpow2.f32 %v814_v4  ;;  %v2358_v30 = vpop.eup %2357  ;;  %283 = vst.msk [vmem:[#allocation2 + $0xc8] sm:$0xff] %vm257_vm1, %v2541_v21  ;;  %284 = vst.msk [vmem:[#allocation2 + $0xd0] sm:$0xff] %vm257_vm1, %v2541_v21 }
 0x18c   : > { %285 = vst.msk [vmem:[#allocation2 + $0xd8] sm:$0xff] %vm257_vm1, %v2541_v21  ;;  %286 = vst.msk [vmem:[#allocation2 + $0xe0] sm:$0xff] %vm257_vm1, %v2541_v21 }
 0x18d   : > { %287 = vst.msk [vmem:[#allocation2 + $0xe8] sm:$0xff] %vm257_vm1, %v2541_v21  ;;  %288 = vst.msk [vmem:[#allocation2 + $0xf0] sm:$0xff] %vm257_vm1, %v2541_v21 }
 0x18e   : > { %v2967_v35 = vpop.xlane.xlu0 %1258  ;;  %v2969_v16 = vpop.xlane.xlu1 %690  ;;  %874 = vadd.xlane.f32.xlu1 %v2358_v30  ;;  %289 = vst.msk [vmem:[#allocation2 + $0xf8] sm:$0xff] %vm257_vm1, %v2541_v21  ;;  %291 = vst.msk [vmem:[#allocation3 + $0x8] sm:$0xff] %vm257_vm1, %v2541_v21 }
 0x18f   : > { %v749_v20 = vsub.f32 %v2781_v50, %v2969_v16  ;;  %292 = vst.msk [vmem:[#allocation3 + $0x10] sm:$0xff] %vm257_vm1, %v2541_v21  ;;  %293 = vst.msk [vmem:[#allocation3 + $0x18] sm:$0xff] %vm257_vm1, %v2541_v21 }
 0x190   : > { %294 = vst.msk [vmem:[#allocation3 + $0x20] sm:$0xff] %vm257_vm1, %v2541_v21  ;;  %295 = vst.msk [vmem:[#allocation3 + $0x28] sm:$0xff] %vm257_vm1, %v2541_v21 }
 0x191   : > { %v2360_v36 = vpop.eup %2359  ;;  %296 = vst.msk [vmem:[#allocation3 + $0x30] sm:$0xff] %vm257_vm1, %v2541_v21  ;;  %297 = vst.msk [vmem:[#allocation3 + $0x38] sm:$0xff] %vm257_vm1, %v2541_v21  ;;  %v786_v23 = vmul.f32 1.442695, %v749_v20 }
 0x192   : > { %v2971_v44 = vpop.xlane.xlu0 %716  ;;  %v2973_v12 = vpop.xlane.xlu1 %722  ;;  %846 = vadd.xlane.f32.xlu1 %v2360_v36  ;;  %298 = vst.msk [vmem:[#allocation3 + $0x40] sm:$0xff] %vm257_vm1, %v2541_v21  ;;  %299 = vst.msk [vmem:[#allocation3 + $0x48] sm:$0xff] %vm257_vm1, %v2541_v21 }
 0x193   : > { %v762_v49 = vsub.f32 %v2774_v46, %v2971_v44  ;;  %300 = vst.msk [vmem:[#allocation3 + $0x50] sm:$0xff] %vm257_vm1, %v2541_v21  ;;  %301 = vst.msk [vmem:[#allocation3 + $0x58] sm:$0xff] %vm257_vm1, %v2541_v21  ;;  %v765_v60 = vsub.f32 %v2783_v51, %v2973_v12 }
 0x194   : > { %302 = vst.msk [vmem:[#allocation3 + $0x60] sm:$0xff] %vm257_vm1, %v2541_v21  ;;  %303 = vst.msk [vmem:[#allocation3 + $0x68] sm:$0xff] %vm257_vm1, %v2541_v21 }
 0x195   : > { %304 = vst.msk [vmem:[#allocation3 + $0x70] sm:$0xff] %vm257_vm1, %v2541_v21  ;;  %305 = vst.msk [vmem:[#allocation3 + $0x78] sm:$0xff] %vm257_vm1, %v2541_v21  ;;  %v2362_v45 = vpop.eup %2361  ;;  %v812_v48 = vmul.f32 1.442695, %v762_v49  ;;  %v818_v46 = vmul.f32 1.442695, %v765_v60 }
 0x196   : > { %306 = vst.msk [vmem:[#allocation3 + $0x80] sm:$0xff] %vm257_vm1, %v2541_v21  ;;  %307 = vst.msk [vmem:[#allocation3 + $0x88] sm:$0xff] %vm257_vm1, %v2541_v21  ;;  %v3110_v57 = vpop.xlane.xlu0 %1232  ;;  %v3112_v38 = vpop.xlane.xlu1 %1234  ;;  %878 = vadd.xlane.f32.xlu1 %v2362_v45 }
 0x197   : > { %308 = vst.msk [vmem:[#allocation3 + $0x90] sm:$0xff] %vm257_vm1, %v2541_v21  ;;  %309 = vst.msk [vmem:[#allocation3 + $0x98] sm:$0xff] %vm257_vm1, %v2541_v21  ;;  %2363 = vpow2.f32 %v812_v48 }
 0x198   : > { %310 = vst.msk [vmem:[#allocation3 + $0xa0] sm:$0xff] %vm257_vm1, %v2541_v21  ;;  %311 = vst.msk [vmem:[#allocation3 + $0xa8] sm:$0xff] %vm257_vm1, %v2541_v21  ;;  %2365 = vpow2.f32 %v786_v23 }
 0x199   : > { %312 = vst.msk [vmem:[#allocation3 + $0xb0] sm:$0xff] %vm257_vm1, %v2541_v21  ;;  %313 = vst.msk [vmem:[#allocation3 + $0xb8] sm:$0xff] %vm257_vm1, %v2541_v21  ;;  %2367 = vpow2.f32 %v818_v46 }
 0x19a   : > { %314 = vst.msk [vmem:[#allocation3 + $0xc0] sm:$0xff] %vm257_vm1, %v2541_v21  ;;  %315 = vst.msk [vmem:[#allocation3 + $0xc8] sm:$0xff] %vm257_vm1, %v2541_v21  ;;  %v3119_v28 = vpop.xlane.xlu0 %1264  ;;  %v3121_v31 = vpop.xlane.xlu1 %694 }
 0x19b   : > { %316 = vst.msk [vmem:[#allocation3 + $0xd0] sm:$0xff] %vm257_vm1, %v2541_v21  ;;  %317 = vst.msk [vmem:[#allocation3 + $0xd8] sm:$0xff] %vm257_vm1, %v2541_v21  ;;  %v751_v48 = vsub.f32 %v2792_v55, %v3121_v31 }
 0x19c   : > { %318 = vst.msk [vmem:[#allocation3 + $0xe0] sm:$0xff] %vm257_vm1, %v2541_v21  ;;  %319 = vst.msk [vmem:[#allocation3 + $0xe8] sm:$0xff] %vm257_vm1, %v2541_v21 }
 0x19d   : > { %320 = vst.msk [vmem:[#allocation3 + $0xf0] sm:$0xff] %vm257_vm1, %v2541_v21  ;;  %321 = vst.msk [vmem:[#allocation3 + $0xf8] sm:$0xff] %vm257_vm1, %v2541_v21 }
 0x19e   : > { %3725 = vst [vmem:[#allocation4_spill] sm:$0xff] %v3121_v31  ;;  %v3123_v4 = vpop.xlane.xlu0 %1230  ;;  %v3125_v43 = vpop.xlane.xlu1 %726 }
 0x19f   : > { %3726 = vst [vmem:[#allocation5_spill] sm:$0xff] %v3125_v43  ;;  %1645 = vrot.lane.b32.xlu0 %v2663_v39, %s2540_s9 }
 0x1a1   : > { %v2364_v50 = vpop.eup %2363 }
 0x1a2   : > { %v3129_v30 = vpop.xlane.xlu0 %1262  ;;  %v3131_v36 = vpop.xlane.xlu1 %1238  ;;  %876 = vadd.xlane.f32.xlu1 %v2364_v50  ;;  %v767_v50 = vsub.f32 %v2794_v56, %v3125_v43  ;;  %v744_v43 = vsub.f32 %v2764_v41, %v2943_v24 }
 0x1a3   : > { %3727 = vst [vmem:[#allocation6_spill] sm:$0xff] %v3131_v36  ;;  %1647 = vrot.lane.b32.xlu0 %v2623_v15, %s2540_s9  ;;  %v2366_v51 = vpop.eup %2365 }
 0x1a4   : > { %v2368_v21 = vpop.eup %2367  ;;  %v776_v31 = vmul.f32 1.442695, %v744_v43 }
 0x1a6   : > { %v3135_v20 = vpop.xlane.xlu0 %688  ;;  %v3137_v49 = vpop.xlane.xlu1 %698  ;;  %850 = vadd.xlane.f32.xlu1 %v2366_v51 }
 0x1a7   : > { %3728 = vst [vmem:[#allocation7_spill] sm:$0xff] %v3137_v49  ;;  %1649 = vrot.lane.b32.xlu0 %v2629_v18, %s2540_s9  ;;  %v790_v18 = vmul.f32 1.442695, %v751_v48 }
 0x1aa   : > { %v3141_v39 = vpop.xlane.xlu0 %720  ;;  %v3143_v45 = vpop.xlane.xlu1 %730  ;;  %882 = vadd.xlane.f32.xlu1 %v2368_v21 }
 0x1ab   : > { %3729 = vst [vmem:[#allocation8_spill] sm:$0xff] %v3143_v45  ;;  %v764_v15 = vsub.f32 %v2785_v53, %v3141_v39  ;;  %1651 = vrot.lane.b32.xlu0 %v2639_v25, %s2540_s9  ;;  %v822_v53 = vmul.f32 1.442695, %v767_v50 }
 0x1ad   : > { %v816_v23 = vmul.f32 1.442695, %v764_v15 }
 0x1ae   : > { %v3151_v60 = vpop.xlane.xlu0 %1236  ;;  %v3153_v46 = vpop.xlane.xlu1 %1242 }
 0x1af   : > { %3730 = vst [vmem:[#allocation9_spill] sm:$0xff] %v3153_v46  ;;  %2369 = vpow2.f32 %v816_v23  ;;  %1653 = vrot.lane.b32.xlu0 %v2651_v32, %s2540_s9 }
 0x1b0   : > { %2371 = vpow2.f32 %v790_v18 }
 0x1b1   : > { %2373 = vpow2.f32 %v822_v53 }
 0x1b2   : > { %v3159_v55 = vpop.xlane.xlu0 %1268  ;;  %v3161_v51 = vpop.xlane.xlu1 %702 }
 0x1b3   : > { %1655 = vrot.lane.b32.xlu0 %v2666_v40, %s2540_s9  ;;  %v753_v40 = vsub.f32 %v2803_v61, %v3137_v49 }
 0x1b5   : > { %v794_v36 = vmul.f32 1.442695, %v753_v40 }
 0x1b6   : > { %v3165_v25 = vpop.xlane.xlu0 %1266  ;;  %v3167_v21 = vpop.xlane.xlu1 %734 }
 0x1b7   : > { %3731 = vst [vmem:[#allocation10_spill] sm:$0xff] %v3167_v21  ;;  %1657 = vrot.lane.b32.xlu0 %v2681_v52, %s2540_s9 }
 0x1b9   : > { %v2370_v56 = vpop.eup %2369 }
 0x1ba   : > { %v3171_v48 = vpop.xlane.xlu0 %692  ;;  %v3173_v32 = vpop.xlane.xlu1 %706  ;;  %880 = vadd.xlane.f32.xlu1 %v2370_v56 }
 0x1bb   : > { %v2372_v15 = vpop.eup %2371 }
 0x1bc   : > { %v2374_v53 = vpop.eup %2373 }
 0x1be   : > { %v3175_v23 = vpop.xlane.xlu0 %724  ;;  %v3177_v18 = vpop.xlane.xlu1 %738  ;;  %854 = vadd.xlane.f32.xlu1 %v2372_v15  ;;  %v769_v15 = vsub.f32 %v2805_v62, %v3143_v45  ;;  %v748_v45 = vsub.f32 %v2789_v54, %v3135_v20 }
 0x1bf   : > { %3732 = vst [vmem:[#allocation11_spill] sm:$0xff] %v3177_v18  ;;  %v766_v50 = vsub.f32 %v2797_v58, %v3175_v23  ;;  %v760_v58 = vsub.f32 %v2766_v42, %v2947_v37 }
 0x1c0   : > { %v826_v41 = vmul.f32 1.442695, %v769_v15 }
 0x1c1   : > { %v820_v52 = vmul.f32 1.442695, %v766_v50  ;;  %v746_v50 = vsub.f32 %v2777_v47, %v2965_v11  ;;  %v808_v62 = vmul.f32 1.442695, %v760_v58  ;;  %v755_v47 = vsub.f32 %v2814_v2, %v3161_v51 }
 0x1c2   : > { %v3185_v46 = vpop.xlane.xlu0 %1240  ;;  %886 = vadd.xlane.f32.xlu1 %v2374_v53  ;;  %v3187_v56 = vpop.xlane.xlu1 %710  ;;  %v784_v58 = vmul.f32 1.442695, %v748_v45 }
 0x1c3   : > { %3733 = vst [vmem:[#allocation12_spill] sm:$0xff] %v3187_v56  ;;  %2375 = vpow2.f32 %v820_v52  ;;  %v780_v52 = vmul.f32 1.442695, %v746_v50 }
 0x1c4   : > { %2377 = vpow2.f32 %v794_v36 }
 0x1c5   : > { %2379 = vpow2.f32 %v776_v31 }
 0x1c6   : > { %v3191_v61 = vpop.xlane.xlu0 %1270  ;;  %v3193_v49 = vpop.xlane.xlu1 %742  ;;  %2381 = vpow2.f32 %v826_v41  ;;  %v771_v41 = vsub.f32 %v2816_v3, %v3167_v21 }
 0x1c7   : > { %3734 = vst [vmem:[#allocation13_spill] sm:$0xff] %v3191_v61  ;;  %3735 = vst [vmem:[#allocation14_spill] sm:$0xff] %v3193_v49  ;;  %2383 = vpow2.f32 %v808_v62  ;;  %v750_v62 = vsub.f32 %v2800_v59, %v3171_v48  ;;  %v757_v59 = vsub.f32 %v2824_v7, %v3173_v32 }
 0x1c8   : > { %2385 = vpow2.f32 %v780_v52 }
 0x1ca   : > { %v3199_v53 = vpop.xlane.xlu0 %696  ;;  %v3201_v40 = vpop.xlane.xlu1 %1276 }
 0x1cb   : > { %3736 = vst [vmem:[#allocation15_spill] sm:$0xff] %v3201_v40  ;;  %v752_v45 = vsub.f32 %v2811_v1, %v3199_v53 }
 0x1cd   : > { %v2376_v43 = vpop.eup %2375 }
 0x1ce   : > { %v3205_v61 = vpop.xlane.xlu0 %728  ;;  %884 = vadd.xlane.f32.xlu1 %v2376_v43  ;;  %v3207_v42 = vpop.xlane.xlu1 %1280  ;;  %v798_v43 = vmul.f32 1.442695, %v755_v47  ;;  %v1579_v47 = vld [vmem:[#allocation3] sm:$0xff] }
 0x1cf   : > { %3737 = vst [vmem:[#allocation16_spill] sm:$0xff] %v3205_v61  ;;  %3738 = vst [vmem:[#allocation17_spill] sm:$0xff] %v3207_v42  ;;  %v768_v31 = vsub.f32 %v2808_v0, %v3205_v61  ;;  %v2378_v36 = vpop.eup %2377  ;;  %v830_v0 = vmul.f32 1.442695, %v771_v41 }
 0x1d0   : > { %v2380_v2 = vpop.eup %2379 }
 0x1d1   : > { %v824_v15 = vmul.f32 1.442695, %v768_v31  ;;  %v2382_v42 = vpop.eup %2381  ;;  %v788_v31 = vmul.f32 1.442695, %v750_v62 }
 0x1d2   : > { %v3215_v54 = vpop.xlane.xlu0 %1244  ;;  %858 = vadd.xlane.f32.xlu1 %v2378_v36  ;;  %v3217_v50 = vpop.xlane.xlu1 %1284 }
 0x1d3   : > { %3739 = vst [vmem:[#allocation18_spill] sm:$0xff] %v3217_v50  ;;  %2387 = vpow2.f32 %v824_v15  ;;  %v2384_v36 = vpop.eup %2383  ;;  %v792_v15 = vmul.f32 1.442695, %v752_v45  ;;  %v773_v45 = vsub.f32 %v2826_v8, %v3177_v18  ;;  %v1583_v50 = vld [vmem:[#allocation3 + $0x20] sm:$0xff] }
 0x1d4   : > { %2389 = vpow2.f32 %v784_v58  ;;  %v2386_v62 = vpop.eup %2385 }
 0x1d5   : > { %2391 = vpow2.f32 %v798_v43 }
 0x1d6   : > { %v3223_v52 = vpop.xlane.xlu0 %700  ;;  %890 = vadd.xlane.f32.xlu1 %v2382_v42  ;;  %v3225_v3 = vpop.xlane.xlu1 %1288  ;;  %840 = vadd.xlane.f32.xlu0 %v2380_v2  ;;  %2393 = vpow2.f32 %v830_v0  ;;  %v802_v0 = vmul.f32 1.442695, %v757_v59 }
 0x1d7   : > { %3740 = vst [vmem:[#allocation19_spill] sm:$0xff] %v3225_v3  ;;  %2395 = vpow2.f32 %v788_v31  ;;  %v754_v1 = vsub.f32 %v2822_v6, %v3223_v52 }
 0x1d8   : > { %2397 = vpow2.f32 %v792_v15 }
 0x1d9   : > { %v796_v31 = vmul.f32 1.442695, %v754_v1 }
 0x1da   : > { %v3229_v58 = vpop.xlane.xlu0 %732  ;;  %872 = vadd.xlane.f32.xlu0 %v2384_v36  ;;  %v1644_v41 = vpop.permute.xlu1 %1643 }
 0x1db   : > { %3741 = vst [vmem:[#allocation20_spill] sm:$0xff] %v3229_v58  ;;  %v770_v42 = vsub.f32 %v2819_v5, %v3229_v58  ;;  %v1739_v43 = vadd.f32 %v1644_v41, %v1579_v47  ;;  %v834_v47 = vmul.f32 1.442695, %v773_v45 }
 0x1dd   : > { %v2388_v2 = vpop.eup %2387  ;;  %v828_v3 = vmul.f32 1.442695, %v770_v42  ;;  %1771 = vst.msk [vmem:[#allocation3] sm:$0xff] %vm257_vm1, %v1739_v43 }
 0x1de   : > { %v3236_v7 = vpop.xlane.xlu0 %1248  ;;  %888 = vadd.xlane.f32.xlu1 %v2388_v2  ;;  %844 = vadd.xlane.f32.xlu0 %v2386_v62  ;;  %v2390_v6 = vpop.eup %2389  ;;  %v759_v62 = vsub.f32 %v2838_v13, %v3187_v56  ;;  %v2494_v56 = vld [vmem:[%s2608_s8] sm:$0xff] }
 0x1df   : > { %2399 = vpow2.f32 %v828_v3  ;;  %v2392_v36 = vpop.eup %2391 }
 0x1e0   : > { %2401 = vpow2.f32 %v802_v0  ;;  %v2394_v59 = vpop.eup %2393 }
 0x1e1   : > { %2403 = vpow2.f32 %v796_v31  ;;  %v2396_v15 = vpop.eup %2395 }
 0x1e2   : > { %v3240_v5 = vpop.xlane.xlu0 %1246  ;;  %862 = vadd.xlane.f32.xlu1 %v2392_v36  ;;  %848 = vadd.xlane.f32.xlu0 %v2390_v6  ;;  %2405 = vpow2.f32 %v834_v47  ;;  %v2398_v3 = vpop.eup %2397  ;;  %v775_v36 = vsub.f32 %v2840_v14, %v3193_v49  ;;  %v1582_v49 = vld [vmem:[#allocation3 + $0x18] sm:$0xff] }
 0x1e4   : > { %v838_v13 = vmul.f32 1.442695, %v775_v36 }
 0x1e6   : > { %v3242_v41 = vpop.xlane.xlu0 %704  ;;  %894 = vadd.xlane.f32.xlu1 %v2394_v59  ;;  %852 = vadd.xlane.f32.xlu0 %v2396_v15 }
 0x1e7   : > { %v756_v8 = vsub.f32 %v2832_v10, %v3242_v41  ;;  %v806_v10 = vmul.f32 1.442695, %v759_v62 }
 0x1e9   : > { %v2400_v1 = vpop.eup %2399  ;;  %v800_v42 = vmul.f32 1.442695, %v756_v8 }
 0x1ea   : > { %v3246_v43 = vpop.xlane.xlu0 %736  ;;  %892 = vadd.xlane.f32.xlu1 %v2400_v1  ;;  %856 = vadd.xlane.f32.xlu0 %v2398_v3  ;;  %v2402_v0 = vpop.eup %2401 }
 0x1eb   : > { %3742 = vst [vmem:[#allocation21_spill] sm:$0xff] %v3246_v43  ;;  %2407 = vpow2.f32 %v800_v42  ;;  %v772_v2 = vsub.f32 %v2828_v9, %v3246_v43  ;;  %v2404_v45 = vpop.eup %2403 }
 0x1ec   : > { %v2406_v47 = vpop.eup %2405 }
 0x1ed   : > { %v832_v31 = vmul.f32 1.442695, %v772_v2 }
 0x1ee   : > { %v3252_v6 = vpop.xlane.xlu0 %1252  ;;  %866 = vadd.xlane.f32.xlu1 %v2402_v0  ;;  %860 = vadd.xlane.f32.xlu0 %v2404_v45 }
 0x1ef   : > { %2409 = vpow2.f32 %v832_v31 }
 0x1f0   : > { %2411 = vpow2.f32 %v806_v10 }
 0x1f1   : > { %2413 = vpow2.f32 %v838_v13 }
 0x1f2   : > { %v3256_v59 = vpop.xlane.xlu0 %1250  ;;  %898 = vadd.xlane.f32.xlu1 %v2406_v47 }
 0x1f3   : > { %3743 = vst [vmem:[#allocation22_spill] sm:$0xff] %v3256_v59 }
 0x1f5   : > { %v2408_v15 = vpop.eup %2407 }
 0x1f6   : > { %v3258_v9 = vpop.xlane.xlu0 %708  ;;  %864 = vadd.xlane.f32.xlu0 %v2408_v15 }
 0x1f7   : > { %3744 = vst [vmem:[#allocation23_spill] sm:$0xff] %v3258_v9  ;;  %v758_v8 = vsub.f32 %v2846_v33, %v3258_v9 }
 0x1f9   : > { %v2410_v3 = vpop.eup %2409  ;;  %v804_v1 = vmul.f32 1.442695, %v758_v8 }
 0x1fa   : > { %896 = vadd.xlane.f32.xlu1 %v2410_v3  ;;  %v3262_v42 = vpop.xlane.xlu0 %740  ;;  %v2412_v62 = vpop.eup %2411  ;;  %v1580_v3 = vld [vmem:[#allocation3 + $0x8] sm:$0xff] }
 0x1fb   : > { %3745 = vst [vmem:[#allocation24_spill] sm:$0xff] %v3262_v42  ;;  %2415 = vpow2.f32 %v804_v1  ;;  %v774_v14 = vsub.f32 %v2844_v29, %v3262_v42  ;;  %v2414_v45 = vpop.eup %2413 }
 0x1fd   : > { %v836_v2 = vmul.f32 1.442695, %v774_v14 }
 0x1fe   : > { %870 = vadd.xlane.f32.xlu1 %v2412_v62  ;;  %v3266_v0 = vpop.xlane.xlu0 %1256 }
 0x1ff   : > { %3746 = vst [vmem:[#allocation25_spill] sm:$0xff] %v3266_v0  ;;  %2417 = vpow2.f32 %v836_v2  ;;  %v1581_v2 = vld [vmem:[#allocation3 + $0x10] sm:$0xff] }
 0x202   : > { %902 = vadd.xlane.f32.xlu1 %v2414_v45  ;;  %v3268_v31 = vpop.xlane.xlu0 %1254  ;;  %v3281_v45 = vld [vmem:[%s2608_s8 + $0x40] sm:$0xff] }
 0x203   : > { %3747 = vst [vmem:[#allocation26_spill] sm:$0xff] %v3268_v31 }
 0x205   : > { %v2416_v33 = vpop.eup %2415 }
 0x206   : > { %868 = vadd.xlane.f32.xlu0 %v2416_v33  ;;  %v3270_v10 = vpop.xlane.xlu0 %1272 }
 0x207   : > { %3748 = vst [vmem:[#allocation27_spill] sm:$0xff] %v3270_v10 }
 0x209   : > { %v2418_v36 = vpop.eup %2417 }
 0x20a   : > { %900 = vadd.xlane.f32.xlu1 %v2418_v36  ;;  %v3272_v47 = vpop.xlane.xlu0 %1274 }
 0x20b   : > { %3749 = vst [vmem:[#allocation28_spill] sm:$0xff] %v3272_v47 }
 0x20e   : > { %v3274_v29 = vpop.xlane.xlu0 %1278 }
 0x20f   : > { %3750 = vst [vmem:[#allocation29_spill] sm:$0xff] %v3274_v29 }
 0x212   : > { %v3276_v13 = vpop.xlane.xlu0 %1282 }
 0x213   : > { %3751 = vst [vmem:[#allocation30_spill] sm:$0xff] %v3276_v13  ;;  %v3293_v13 = vld [vmem:[%s2608_s8 + $0x50] sm:$0xff] }
 0x216   : > { %v3278_v15 = vpop.xlane.xlu0 %1286 }
 0x217   : > { %3752 = vst [vmem:[#allocation31_spill] sm:$0xff] %v3278_v15  ;;  %v843_v8 = vpop.xlane.xlu1 %842  ;;  %v3287_v15 = vld [vmem:[%s2608_s8 + $0x48] sm:$0xff] }
 0x218   : > { %2419 = vlog2.f32 %v843_v8 }
 0x21a   : > { %v1646_v1 = vpop.permute.xlu0 %1645 }
 0x21b   : > { %v1740_v14 = vadd.f32 %v1646_v1, %v1580_v3  ;;  %v875_v62 = vpop.xlane.xlu1 %874 }
 0x21c   : > { %1659 = vrot.lane.b32.xlu0 %v3281_v45, %s2540_s9  ;;  %2421 = vlog2.f32 %v875_v62 }
 0x21d   : > { %1772 = vst.msk [vmem:[#allocation3 + $0x8] sm:$0xff] %vm257_vm1, %v1740_v14 }
 0x21e   : > { %v1648_v33 = vpop.permute.xlu0 %1647 }
 0x21f   : > { %v1741_v36 = vadd.f32 %v1648_v33, %v1581_v2 }
 0x220   : > { %1661 = vrot.lane.b32.xlu0 %v3287_v15, %s2540_s9 }
 0x221   : > { %1773 = vst.msk [vmem:[#allocation3 + $0x10] sm:$0xff] %vm257_vm1, %v1741_v36 }
 0x222   : > { %v1650_v8 = vpop.permute.xlu0 %1649  ;;  %v2420_v3 = vpop.eup %2419 }
 0x223   : > { %v1742_v1 = vadd.f32 %v1650_v8, %v1582_v49  ;;  %v907_v42 = vmul.f32 0.6931472, %v2420_v3  ;;  %v1584_v49 = vld [vmem:[#allocation3 + $0x28] sm:$0xff]  ;;  %v3301_v8 = vld [vmem:[%s2608_s8 + $0x58] sm:$0xff] }
 0x224   : > { %1663 = vrot.lane.b32.xlu0 %v3293_v13, %s2540_s9 }
 0x225   : > { %1774 = vst.msk [vmem:[#allocation3 + $0x18] sm:$0xff] %vm257_vm1, %v1742_v1  ;;  %v969_v14 = vadd.f32 %v907_v42, %v2933_v34  ;;  %v2487_v34 = vld [vmem:[%s2608_s8 + $0x8] sm:$0xff] }
 0x226   : > { %v1652_v62 = vpop.permute.xlu0 %1651  ;;  %v2422_v2 = vpop.eup %2421 }
 0x227   : > { %v1743_v33 = vadd.f32 %v1652_v62, %v1583_v50  ;;  %v1323_v36 = vsub.f32 %v969_v14, %v2941_v26  ;;  %v939_v18 = vmul.f32 0.6931472, %v2422_v2  ;;  %v1585_v26 = vld [vmem:[#allocation3 + $0x30] sm:$0xff]  ;;  %v3311_v14 = vld [vmem:[%s2608_s8 + $0x60] sm:$0xff] }
 0x228   : > { %1665 = vrot.lane.b32.xlu0 %v3301_v8, %s2540_s9  ;;  %3753 = vst [vmem:[#allocation32_spill] sm:$0xff] %v3311_v14 }
 0x229   : > { %1775 = vst.msk [vmem:[#allocation3 + $0x20] sm:$0xff] %vm257_vm1, %v1743_v33  ;;  %v985_v3 = vadd.f32 %v939_v18, %v2931_v17  ;;  %v1355_v42 = vmul.f32 %v2487_v34, %v1323_v36  ;;  %v3317_v17 = vld [vmem:[%s2608_s8 + $0x88] sm:$0xff]  ;;  %v847_v36 = vpop.xlane.xlu1 %846  ;;  %v3334_v34 = vld [vmem:[%s2608_s8 + $0x78] sm:$0xff] }
 0x22a   : > { %v1654_v1 = vpop.permute.xlu0 %1653  ;;  %v3322_v33 = vld [vmem:[%s2608_s8 + $0x68] sm:$0xff]  ;;  %3756 = vst [vmem:[#allocation35_spill] sm:$0xff] %v3334_v34  ;;  %2423 = vlog2.f32 %v847_v36 }
 0x22b   : > { %v1744_v43 = vadd.f32 %v1654_v1, %v1584_v49  ;;  %v1339_v50 = vsub.f32 %v985_v3, %v2955_v27  ;;  %1420 = vrot.lane.b32.xlu1 %v1355_v42, %s2540_s9  ;;  %v1586_v27 = vld [vmem:[#allocation3 + $0x38] sm:$0xff]  ;;  %3754 = vst [vmem:[#allocation33_spill] sm:$0xff] %v3322_v33  ;;  %v3328_v3 = vld [vmem:[%s2608_s8 + $0x70] sm:$0xff] }
 0x22c   : > { %1667 = vrot.lane.b32.xlu0 %v3311_v14, %s2540_s9  ;;  %3755 = vst [vmem:[#allocation34_spill] sm:$0xff] %v3328_v3 }
 0x22d   : > { %1776 = vst.msk [vmem:[#allocation3 + $0x28] sm:$0xff] %vm257_vm1, %v1744_v43  ;;  %v1371_v18 = vmul.f32 %v3317_v17, %v1339_v50  ;;  %v879_v1 = vpop.xlane.xlu1 %878  ;;  %v2493_v50 = vld [vmem:[%s2608_s8 + $0x80] sm:$0xff] }
 0x22e   : > { %v1656_v62 = vpop.permute.xlu0 %1655 }
 0x22f   : > { %v1745_v2 = vadd.f32 %v1656_v62, %v1585_v26  ;;  %1452 = vrot.lane.b32.xlu1 %v1371_v18, %s2540_s9 }
 0x230   : > { %1669 = vrot.lane.b32.xlu0 %v3322_v33, %s2540_s9 }
 0x231   : > { %1777 = vst.msk [vmem:[#allocation3 + $0x30] sm:$0xff] %vm257_vm1, %v1745_v2  ;;  %v877_v42 = vpop.xlane.xlu1 %876 }
 0x232   : > { %v1658_v43 = vpop.permute.xlu0 %1657 }
 0x233   : > { %v1746_v49 = vadd.f32 %v1658_v43, %v1586_v27 }
 0x234   : > { %1671 = vrot.lane.b32.xlu0 %v3328_v3, %s2540_s9  ;;  %v2424_v3 = vpop.eup %2423 }
 0x235   : > { %1778 = vst.msk [vmem:[#allocation3 + $0x38] sm:$0xff] %vm257_vm1, %v1746_v49  ;;  %v851_v26 = vpop.xlane.xlu1 %850  ;;  %v911_v14 = vmul.f32 0.6931472, %v2424_v3 }
 0x238   : > { %1673 = vrot.lane.b32.xlu0 %v3334_v34, %s2540_s9 }
 0x239   : > { %v883_v62 = vpop.xlane.xlu1 %882 }
 0x23c   : > { %1675 = vrot.lane.b32.xlu0 %v2493_v50, %s2540_s9 }
 0x247   : > { %v881_v18 = vpop.xlane.xlu1 %880 }
 0x24b   : > { %v3340_v2 = vpop.xlane.xlu1 %854 }
 0x24f   : > { %v3342_v27 = vpop.xlane.xlu1 %886 }
 0x25b   : > { %v3344_v43 = vpop.xlane.xlu1 %884 }
 0x25f   : > { %v3346_v49 = vpop.xlane.xlu1 %858 }
 0x263   : > { %v841_v29 = vpop.xlane.xlu0 %840  ;;  %v3348_v21 = vpop.xlane.xlu1 %890 }
 0x264   : > { %2425 = vlog2.f32 %v841_v29 }
 0x265   : > { %2427 = vlog2.f32 %v879_v1 }
 0x267   : > { %v873_v58 = vpop.xlane.xlu0 %872 }
 0x268   : > { %2429 = vlog2.f32 %v873_v58 }
 0x26b   : > { %v3350_v40 = vpop.xlane.xlu1 %888  ;;  %v845_v47 = vpop.xlane.xlu0 %844 }
 0x26c   : > { %2431 = vlog2.f32 %v845_v47  ;;  %v971_v47 = vadd.f32 %v911_v14, %v2949_v19 }
 0x26d   : > { %2433 = vlog2.f32 %v877_v42 }
 0x26e   : > { %v2426_v61 = vpop.eup %2425  ;;  %2435 = vlog2.f32 %v851_v26 }
 0x26f   : > { %v3352_v10 = vpop.xlane.xlu1 %862  ;;  %v905_v34 = vmul.f32 0.6931472, %v2426_v61  ;;  %v2428_v31 = vpop.eup %2427  ;;  %2437 = vlog2.f32 %v883_v62  ;;  %v2497_v62 = vld [vmem:[%s2608_s8 + $0x98] sm:$0xff] }
 0x270   : > { %v943_v0 = vmul.f32 0.6931472, %v2428_v31 }
 0x271   : > { %v968_v29 = vadd.f32 %v905_v34, %v2943_v24  ;;  %v1325_v24 = vsub.f32 %v971_v47, %v3110_v57  ;;  %v849_v34 = vpop.xlane.xlu0 %848 }
 0x272   : > { %v2430_v36 = vpop.eup %2429  ;;  %2439 = vlog2.f32 %v849_v34 }
 0x273   : > { %v937_v1 = vmul.f32 0.6931472, %v2430_v36  ;;  %v1322_v58 = vsub.f32 %v968_v29, %v2963_v22  ;;  %v3356_v9 = vpop.xlane.xlu1 %894  ;;  %v987_v22 = vadd.f32 %v943_v0, %v2957_v63  ;;  %v2495_v63 = vld [vmem:[%s2608_s8 + $0x18] sm:$0xff]  ;;  %2441 = vlog2.f32 %v881_v18 }
 0x274   : > { %2443 = vlog2.f32 %v3340_v2 }
 0x275   : > { %v984_v33 = vadd.f32 %v937_v1, %v2947_v37  ;;  %v1354_v59 = vmul.f32 %v2494_v56, %v1322_v58  ;;  %v1341_v37 = vsub.f32 %v987_v22, %v3119_v28  ;;  %v1357_v56 = vmul.f32 %v2495_v63, %v1325_v24  ;;  %v853_v0 = vpop.xlane.xlu0 %852 }
 0x276   : > { %v2432_v42 = vpop.eup %2431  ;;  %2445 = vlog2.f32 %v853_v0 }
 0x277   : > { %v1338_v61 = vsub.f32 %v984_v33, %v2967_v35  ;;  %1418 = vrot.lane.b32.xlu0 %v1354_v59, %s2540_s9  ;;  %v909_v3 = vmul.f32 0.6931472, %v2432_v42  ;;  %v2434_v19 = vpop.eup %2433  ;;  %v3365_v31 = vpop.xlane.xlu1 %892  ;;  %v2496_v33 = vld [vmem:[%s2608_s8 + $0x90] sm:$0xff]  ;;  %2447 = vlog2.f32 %v3344_v43 }
 0x278   : > { %v941_v35 = vmul.f32 0.6931472, %v2434_v19  ;;  %v2436_v59 = vpop.eup %2435  ;;  %2449 = vlog2.f32 %v3346_v49  ;;  %v3410_v43 = vld [vmem:[%s2608_s8 + $0xb0] sm:$0xff]  ;;  %v3420_v49 = vld [vmem:[%s2608_s8 + $0xb8] sm:$0xff] }
 0x279   : > { %v1370_v26 = vmul.f32 %v2493_v50, %v1338_v61  ;;  %v970_v57 = vadd.f32 %v909_v3, %v2965_v11  ;;  %v915_v50 = vmul.f32 0.6931472, %v2436_v59  ;;  %v1373_v11 = vmul.f32 %v2497_v62, %v1341_v37  ;;  %v2438_v36 = vpop.eup %2437  ;;  %v857_v58 = vpop.xlane.xlu0 %856  ;;  %v2499_v61 = vld [vmem:[%s2608_s8 + $0xa0] sm:$0xff] }
 0x27a   : > { %v947_v1 = vmul.f32 0.6931472, %v2438_v36  ;;  %2451 = vlog2.f32 %v857_v58  ;;  %v1587_v36 = vld [vmem:[#allocation3 + $0x40] sm:$0xff] }
 0x27b   : > { %1450 = vrot.lane.b32.xlu1 %v1370_v26, %s2540_s9  ;;  %1677 = vrot.lane.b32.xlu0 %v3317_v17, %s2540_s9  ;;  %v3374_v14 = vpop.xlane.xlu1 %866  ;;  %v986_v17 = vadd.f32 %v941_v35, %v2971_v44  ;;  %v1324_v28 = vsub.f32 %v970_v57, %v3123_v4  ;;  %v973_v29 = vadd.f32 %v915_v50, %v2969_v16  ;;  %v2498_v44 = vld [vmem:[%s2608_s8 + $0x10] sm:$0xff]  ;;  %v2500_v26 = vld [vmem:[%s2608_s8 + $0xa8] sm:$0xff]  ;;  %2453 = vlog2.f32 %v3352_v10 }
 0x27c   : > { %v2440_v4 = vpop.eup %2439  ;;  %v3432_v58 = vld [vmem:[%s2608_s8 + $0xc0] sm:$0xff] }
 0x27d   : > { %v1340_v18 = vsub.f32 %v986_v17, %v3129_v30  ;;  %v1356_v47 = vmul.f32 %v2498_v44, %v1324_v28  ;;  %v1327_v2 = vsub.f32 %v973_v29, %v3151_v60  ;;  %v989_v30 = vadd.f32 %v947_v1, %v2973_v12  ;;  %v2442_v22 = vpop.eup %2441  ;;  %v861_v34 = vpop.xlane.xlu0 %860  ;;  %v2501_v12 = vld [vmem:[%s2608_s8 + $0x28] sm:$0xff]  ;;  %v3757_v28 = vld [vmem:[#allocation4_spill] sm:$0xff] }
 0x27e   : > { %v913_v16 = vmul.f32 0.6931472, %v2440_v4  ;;  %v945_v37 = vmul.f32 0.6931472, %v2442_v22  ;;  %v2444_v57 = vpop.eup %2443  ;;  %2455 = vlog2.f32 %v861_v34  ;;  %v3443_v22 = vld [vmem:[%s2608_s8 + $0xc8] sm:$0xff] }
 0x27f   : > { %1424 = vrot.lane.b32.xlu1 %v1357_v56, %s2540_s9  ;;  %1679 = vrot.lane.b32.xlu0 %v2496_v33, %s2540_s9  ;;  %v3387_v42 = vpop.xlane.xlu1 %898  ;;  %v1372_v24 = vmul.f32 %v2496_v33, %v1340_v18  ;;  %v1343_v19 = vsub.f32 %v989_v30, %v3159_v55  ;;  %v1359_v35 = vmul.f32 %v2501_v12, %v1327_v2  ;;  %v919_v55 = vmul.f32 0.6931472, %v2444_v57  ;;  %v1588_v30 = vld [vmem:[#allocation3 + $0x48] sm:$0xff] }
 0x280   : > { %v972_v60 = vadd.f32 %v913_v16, %v3135_v20  ;;  %v988_v20 = vadd.f32 %v945_v37, %v3141_v39  ;;  %v2446_v33 = vpop.eup %2445  ;;  %2457 = vlog2.f32 %v3374_v14 }
 0x281   : > { %v1375_v0 = vmul.f32 %v2500_v26, %v1343_v19  ;;  %v975_v39 = vadd.f32 %v919_v55, %v3757_v28  ;;  %v2448_v18 = vpop.eup %2447  ;;  %v3758_v19 = vld [vmem:[#allocation6_spill] sm:$0xff]  ;;  %v3760_v28 = vld [vmem:[#allocation7_spill] sm:$0xff] }
 0x282   : > { %v1326_v59 = vsub.f32 %v972_v60, %v3112_v38  ;;  %v1342_v50 = vsub.f32 %v988_v20, %v3165_v25  ;;  %v2450_v16 = vpop.eup %2449  ;;  %v2507_v60 = vld [vmem:[%s2608_s8 + $0x38] sm:$0xff] }
 0x283   : > { %1456 = vrot.lane.b32.xlu1 %v1373_v11, %s2540_s9  ;;  %1681 = vrot.lane.b32.xlu0 %v2497_v62, %s2540_s9  ;;  %v3403_v63 = vpop.xlane.xlu0 %864  ;;  %v917_v62 = vmul.f32 0.6931472, %v2446_v33  ;;  %v2504_v11 = vld [vmem:[%s2608_s8 + $0x20] sm:$0xff]  ;;  %v1329_v44 = vsub.f32 %v975_v39, %v3185_v46  ;;  %v3759_v33 = vld [vmem:[#allocation13_spill] sm:$0xff] }
 0x284   : > { %v1358_v38 = vmul.f32 %v2504_v11, %v1326_v59  ;;  %v1374_v2 = vmul.f32 %v2499_v61, %v1342_v50  ;;  %v2452_v57 = vpop.eup %2451  ;;  %v3454_v59 = vld [vmem:[%s2608_s8 + $0xd0] sm:$0xff]  ;;  %2459 = vlog2.f32 %v3403_v63 }
 0x285   : > { %v974_v4 = vadd.f32 %v917_v62, %v3171_v48  ;;  %v1291_v48 = vld [vmem:[#allocation2 + $0x8] sm:$0xff]  ;;  %v1361_v12 = vmul.f32 %v2507_v60, %v1329_v44  ;;  %v921_v62 = vmul.f32 0.6931472, %v2452_v57  ;;  %v2509_v11 = vld [vmem:[%s2608_s8 + $0x30] sm:$0xff]  ;;  %v3466_v44 = vld [vmem:[%s2608_s8 + $0xd8] sm:$0xff] }
 0x287   : > { %1422 = vrot.lane.b32.xlu1 %v1356_v47, %s2540_s9  ;;  %1683 = vrot.lane.b32.xlu0 %v2499_v61, %s2540_s9  ;;  %v3394_v3 = vpop.xlane.xlu1 %896  ;;  %v949_v47 = vmul.f32 0.6931472, %v2448_v18  ;;  %v1328_v37 = vsub.f32 %v974_v4, %v3758_v19  ;;  %v2454_v18 = vpop.eup %2453 }
 0x289   : > { %v990_v61 = vadd.f32 %v949_v47, %v3175_v23 }
 0x28b   : > { %1454 = vrot.lane.b32.xlu1 %v1372_v24, %s2540_s9  ;;  %1685 = vrot.lane.b32.xlu0 %v2500_v26, %s2540_s9  ;;  %v3407_v56 = vpop.xlane.xlu1 %870  ;;  %v923_v26 = vmul.f32 0.6931472, %v2450_v16  ;;  %v1344_v50 = vsub.f32 %v990_v61, %v3759_v33  ;;  %v3761_v61 = vld [vmem:[#allocation9_spill] sm:$0xff] }
 0x28c   : > { %2461 = vlog2.f32 %v3407_v56 }
 0x28d   : > { %v977_v39 = vadd.f32 %v923_v26, %v3760_v28  ;;  %v1376_v16 = vmul.f32 %v3410_v43, %v1344_v50  ;;  %v1594_v50 = vld [vmem:[#allocation3 + $0x78] sm:$0xff] }
 0x28f   : > { %1428 = vrot.lane.b32.xlu1 %v1359_v35, %s2540_s9  ;;  %1687 = vrot.lane.b32.xlu0 %v3410_v43, %s2540_s9  ;;  %v3427_v29 = vpop.xlane.xlu1 %902  ;;  %v1589_v35 = vld [vmem:[#allocation3 + $0x50] sm:$0xff]  ;;  %v1331_v4 = vsub.f32 %v977_v39, %v3215_v54  ;;  %v3511_v39 = vld [vmem:[%s2608_s8 + $0xf8] sm:$0xff] }
 0x291   : > { %v1363_v19 = vmul.f32 %v3287_v15, %v1331_v4  ;;  %v3764_v4 = vld [vmem:[#allocation33_spill] sm:$0xff] }
 0x293   : > { %1460 = vrot.lane.b32.xlu1 %v1375_v0, %s2540_s9  ;;  %v3417_v17 = vpop.xlane.xlu0 %868  ;;  %1689 = vrot.lane.b32.xlu0 %v3420_v49, %s2540_s9  ;;  %v1307_v0 = vld [vmem:[#allocation2 + $0x88] sm:$0xff] }
 0x294   : > { %2463 = vlog2.f32 %v3417_v17 }
 0x295   : > { %2465 = vlog2.f32 %v3342_v27 }
 0x296   : > { %2467 = vlog2.f32 %v3350_v40 }
 0x297   : > { %1426 = vrot.lane.b32.xlu1 %v1358_v38, %s2540_s9  ;;  %v1660_v1 = vpop.permute.xlu0 %1659  ;;  %1691 = vrot.lane.b32.xlu0 %v3432_v58, %s2540_s9  ;;  %v3438_v24 = vpop.xlane.xlu1 %900  ;;  %v1360_v38 = vmul.f32 %v2509_v11, %v1328_v37  ;;  %v1592_v37 = vld [vmem:[#allocation3 + $0x68] sm:$0xff]  ;;  %2469 = vlog2.f32 %v3348_v21 }
 0x298   : > { %v1747_v25 = vadd.f32 %v1660_v1, %v1587_v36  ;;  %v1590_v36 = vld [vmem:[#allocation3 + $0x58] sm:$0xff]  ;;  %2471 = vlog2.f32 %v3365_v31 }
 0x299   : > { %2473 = vlog2.f32 %v3356_v9 }
 0x29a   : > { %1779 = vst.msk [vmem:[#allocation3 + $0x40] sm:$0xff] %vm257_vm1, %v1747_v25  ;;  %2475 = vlog2.f32 %v3394_v3 }
 0x29b   : > { %1458 = vrot.lane.b32.xlu1 %v1374_v2, %s2540_s9  ;;  %v1662_v10 = vpop.permute.xlu0 %1661  ;;  %1693 = vrot.lane.b32.xlu0 %v3443_v22, %s2540_s9  ;;  %v927_v2 = vmul.f32 0.6931472, %v2454_v18  ;;  %2477 = vlog2.f32 %v3387_v42 }
 0x29c   : > { %v1748_v46 = vadd.f32 %v1662_v10, %v1588_v30  ;;  %v976_v30 = vadd.f32 %v921_v62, %v3199_v53  ;;  %v1591_v10 = vld [vmem:[#allocation3 + $0x60] sm:$0xff]  ;;  %2479 = vlog2.f32 %v3438_v24 }
 0x29d   : > { %v1421_v34 = vpop.permute.xlu1 %1420  ;;  %v979_v54 = vadd.f32 %v927_v2, %v3161_v51  ;;  %2481 = vlog2.f32 %v3427_v29  ;;  %v3782_v29 = vld [vmem:[#allocation11_spill] sm:$0xff] }
 0x29e   : > { %1780 = vst.msk [vmem:[#allocation3 + $0x48] sm:$0xff] %vm257_vm1, %v1748_v46  ;;  %v1515_v20 = vadd.f32 %v1421_v34, %v1291_v48  ;;  %v2456_v46 = vpop.eup %2455  ;;  %v3478_v48 = vld [vmem:[%s2608_s8 + $0xe0] sm:$0xff]  ;;  %v1330_v43 = vsub.f32 %v976_v30, %v3761_v61  ;;  %v3765_v30 = vld [vmem:[#allocation25_spill] sm:$0xff] }
 0x29f   : > { %1432 = vrot.lane.b32.xlu1 %v1361_v12, %s2540_s9  ;;  %v1664_v55 = vpop.permute.xlu0 %1663  ;;  %1695 = vrot.lane.b32.xlu0 %v3454_v59, %s2540_s9  ;;  %v925_v26 = vmul.f32 0.6931472, %v2456_v46  ;;  %v2458_v60 = vpop.eup %2457  ;;  %v3489_v12 = vld [vmem:[%s2608_s8 + $0xe8] sm:$0xff]  ;;  %v3767_v46 = vld [vmem:[#allocation32_spill] sm:$0xff] }
 0x2a0   : > { %v1749_v23 = vadd.f32 %v1664_v55, %v1589_v35  ;;  %1548 = vst.msk [vmem:[#allocation2 + $0x8] sm:$0xff] %vm257_vm1, %v1515_v20  ;;  %v1333_v35 = vsub.f32 %v979_v54, %v3236_v7  ;;  %v931_v57 = vmul.f32 0.6931472, %v2458_v60  ;;  %v1362_v34 = vmul.f32 %v3281_v45, %v1330_v43  ;;  %v1593_v20 = vld [vmem:[#allocation3 + $0x70] sm:$0xff]  ;;  %v2460_v55 = vpop.eup %2459  ;;  %v3768_v54 = vld [vmem:[#allocation5_spill] sm:$0xff] }
 0x2a1   : > { %v1453_v14 = vpop.permute.xlu1 %1452  ;;  %v978_v15 = vadd.f32 %v925_v26, %v3223_v52  ;;  %v2462_v28 = vpop.eup %2461  ;;  %v3769_v26 = vld [vmem:[#allocation26_spill] sm:$0xff] }
 0x2a2   : > { %1781 = vst.msk [vmem:[#allocation3 + $0x50] sm:$0xff] %vm257_vm1, %v1749_v23  ;;  %v1531_v1 = vadd.f32 %v1453_v14, %v1307_v0  ;;  %v3500_v23 = vld [vmem:[%s2608_s8 + $0xf0] sm:$0xff]  ;;  %v981_v52 = vadd.f32 %v931_v57, %v3173_v32  ;;  %v929_v0 = vmul.f32 0.6931472, %v2460_v55  ;;  %v1365_v33 = vmul.f32 %v3301_v8, %v1333_v35  ;;  %v3772_v57 = vld [vmem:[#allocation16_spill] sm:$0xff] }
 0x2a3   : > { %1430 = vrot.lane.b32.xlu1 %v1360_v38, %s2540_s9  ;;  %v1666_v25 = vpop.permute.xlu0 %1665  ;;  %1697 = vrot.lane.b32.xlu0 %v3466_v44, %s2540_s9  ;;  %v1332_v45 = vsub.f32 %v978_v15, %v3240_v5  ;;  %v935_v8 = vmul.f32 0.6931472, %v2462_v28  ;;  %v1595_v38 = vld [vmem:[#allocation3 + $0x80] sm:$0xff]  ;;  %v3762_v14 = vld [vmem:[#allocation22_spill] sm:$0xff] }
 0x2a4   : > { %v1750_v47 = vadd.f32 %v1666_v25, %v1590_v36  ;;  %1564 = vst.msk [vmem:[#allocation2 + $0x88] sm:$0xff] %vm257_vm1, %v1531_v1  ;;  %v1335_v5 = vsub.f32 %v981_v52, %v3252_v6  ;;  %v980_v62 = vadd.f32 %v929_v0, %v3242_v41  ;;  %v2464_v36 = vpop.eup %2463  ;;  %v3763_v25 = vld [vmem:[#allocation12_spill] sm:$0xff] }
 0x2a5   : > { %v1364_v11 = vmul.f32 %v3293_v13, %v1332_v45  ;;  %v933_v6 = vmul.f32 0.6931472, %v2464_v36  ;;  %v2466_v2 = vpop.eup %2465  ;;  %v3774_v55 = vld [vmem:[#allocation8_spill] sm:$0xff] }
 0x2a6   : > { %1782 = vst.msk [vmem:[#allocation3 + $0x58] sm:$0xff] %vm257_vm1, %v1750_v47  ;;  %v1334_v1 = vsub.f32 %v980_v62, %v3762_v14  ;;  %v983_v47 = vadd.f32 %v935_v8, %v3763_v25  ;;  %v1367_v41 = vmul.f32 %v3764_v4, %v1335_v5  ;;  %v951_v13 = vmul.f32 0.6931472, %v2466_v2  ;;  %v3778_v62 = vld [vmem:[#allocation10_spill] sm:$0xff] }
 0x2a7   : > { %1462 = vrot.lane.b32.xlu1 %v1376_v16, %s2540_s9  ;;  %v1668_v63 = vpop.permute.xlu0 %1667  ;;  %1699 = vrot.lane.b32.xlu0 %v3478_v48, %s2540_s9  ;;  %v3783_v4 = vld [vmem:[#allocation30_spill] sm:$0xff] }
 0x2a8   : > { %v1751_v53 = vadd.f32 %v1668_v63, %v1591_v10  ;;  %v1337_v16 = vsub.f32 %v983_v47, %v3765_v30  ;;  %v3766_v10 = vld [vmem:[#allocation23_spill] sm:$0xff]  ;;  %v1366_v63 = vmul.f32 %v3767_v46, %v1334_v1  ;;  %v991_v61 = vadd.f32 %v951_v13, %v3768_v54  ;;  %v3781_v1 = vld [vmem:[#allocation21_spill] sm:$0xff]  ;;  %v3784_v30 = vld [vmem:[#allocation18_spill] sm:$0xff] }
 0x2a9   : > { %v982_v21 = vadd.f32 %v933_v6, %v3766_v10  ;;  %v3787_v54 = vld [vmem:[#allocation31_spill] sm:$0xff] }
 0x2aa   : > { %1783 = vst.msk [vmem:[#allocation3 + $0x60] sm:$0xff] %vm257_vm1, %v1751_v53  ;;  %v2468_v53 = vpop.eup %2467 }
 0x2ab   : > { %1436 = vrot.lane.b32.xlu1 %v1363_v19, %s2540_s9  ;;  %v1670_v56 = vpop.permute.xlu0 %1669  ;;  %1701 = vrot.lane.b32.xlu0 %v3489_v12, %s2540_s9  ;;  %v953_v43 = vmul.f32 0.6931472, %v2468_v53  ;;  %v1336_v19 = vsub.f32 %v982_v21, %v3769_v26  ;;  %v2470_v31 = vpop.eup %2469  ;;  %v3785_v21 = vld [vmem:[#allocation24_spill] sm:$0xff] }
 0x2ac   : > { %v1752_v51 = vadd.f32 %v1670_v56, %v1592_v37  ;;  %v3770_v37 = vld [vmem:[#allocation35_spill] sm:$0xff]  ;;  %v955_v35 = vmul.f32 0.6931472, %v2470_v31  ;;  %v2472_v9 = vpop.eup %2471 }
 0x2ad   : > { %v1369_v60 = vmul.f32 %v3770_v37, %v1337_v16  ;;  %v3771_v56 = vld [vmem:[#allocation27_spill] sm:$0xff]  ;;  %v992_v15 = vadd.f32 %v953_v43, %v3772_v57  ;;  %v957_v45 = vmul.f32 0.6931472, %v2472_v9  ;;  %v2474_v3 = vpop.eup %2473  ;;  %v1290_v37 = vld [vmem:[#allocation2] sm:$0xff]  ;;  %v1597_v9 = vld [vmem:[#allocation3 + $0x90] sm:$0xff] }
 0x2ae   : > { %1784 = vst.msk [vmem:[#allocation3 + $0x68] sm:$0xff] %vm257_vm1, %v1752_v51  ;;  %v1345_v51 = vsub.f32 %v991_v61, %v3771_v56  ;;  %v959_v28 = vmul.f32 0.6931472, %v2474_v3  ;;  %v2476_v42 = vpop.eup %2475  ;;  %v1306_v56 = vld [vmem:[#allocation2 + $0x80] sm:$0xff]  ;;  %v1309_v3 = vld [vmem:[#allocation2 + $0x98] sm:$0xff] }
 0x2af   : > { %1434 = vrot.lane.b32.xlu1 %v1362_v34, %s2540_s9  ;;  %v1672_v17 = vpop.permute.xlu0 %1671  ;;  %1703 = vrot.lane.b32.xlu0 %v3500_v23, %s2540_s9  ;;  %v3773_v34 = vld [vmem:[#allocation34_spill] sm:$0xff]  ;;  %v2478_v24 = vpop.eup %2477 }
 0x2b0   : > { %v1753_v7 = vadd.f32 %v1672_v17, %v1593_v20  ;;  %v1368_v20 = vmul.f32 %v3773_v34, %v1336_v19  ;;  %v993_v17 = vadd.f32 %v955_v35, %v3774_v55  ;;  %v1377_v0 = vmul.f32 %v3420_v49, %v1345_v51  ;;  %v3779_v49 = vld [vmem:[#allocation29_spill] sm:$0xff]  ;;  %v2480_v47 = vpop.eup %2479  ;;  %v1293_v34 = vld [vmem:[#allocation2 + $0x18] sm:$0xff]  ;;  %v1915_v55 = vld [vmem:[#allocation3 + $0x10] sm:$0xff] }
 0x2b1   : > { %v995_v8 = vadd.f32 %v959_v28, %v3778_v62  ;;  %v963_v14 = vmul.f32 0.6931472, %v2478_v24  ;;  %v965_v2 = vmul.f32 0.6931472, %v2480_v47  ;;  %v2482_v13 = vpop.eup %2481  ;;  %v1596_v51 = vld [vmem:[#allocation3 + $0x88] sm:$0xff]  ;;  %v1948_v28 = vsel %vm257_vm1, %v1915_v55, 0.0 }
 0x2b2   : > { %1785 = vst.msk [vmem:[#allocation3 + $0x70] sm:$0xff] %vm257_vm1, %v1753_v7  ;;  %v3775_v7 = vld [vmem:[#allocation28_spill] sm:$0xff]  ;;  %v967_v10 = vmul.f32 0.6931472, %v2482_v13 }
 0x2b3   : > { %1440 = vrot.lane.b32.xlu1 %v1365_v33, %s2540_s9  ;;  %v1674_v27 = vpop.permute.xlu0 %1673  ;;  %1705 = vrot.lane.b32.xlu0 %v3511_v39, %s2540_s9  ;;  %v1346_v52 = vsub.f32 %v992_v15, %v3775_v7  ;;  %v3776_v33 = vld [vmem:[#allocation15_spill] sm:$0xff]  ;;  %v997_v6 = vadd.f32 %v963_v14, %v3782_v29  ;;  %v998_v46 = vadd.f32 %v965_v2, %v3785_v21  ;;  %v1599_v24 = vld [vmem:[#allocation3 + $0xa0] sm:$0xff]  ;;  %v1600_v2 = vld [vmem:[#allocation3 + $0xa8] sm:$0xff] }
 0x2b4   : > { %v1754_v32 = vadd.f32 %v1674_v27, %v1594_v50  ;;  %v1347_v50 = vsub.f32 %v993_v17, %v3776_v33  ;;  %v3777_v27 = vld [vmem:[#allocation20_spill] sm:$0xff]  ;;  %v1916_v33 = vld [vmem:[#allocation3 + $0x18] sm:$0xff] }
 0x2b5   : > { %v1378_v5 = vmul.f32 %v3432_v58, %v1346_v52  ;;  %v1351_v16 = vsub.f32 %v997_v6, %v3784_v30  ;;  %v1352_v61 = vsub.f32 %v998_v46, %v3787_v54  ;;  %v1308_v6 = vld [vmem:[#allocation2 + $0x90] sm:$0xff]  ;;  %v1922_v54 = vld [vmem:[#allocation3 + $0x48] sm:$0xff] }
 0x2b6   : > { %1786 = vst.msk [vmem:[#allocation3 + $0x78] sm:$0xff] %vm257_vm1, %v1754_v32  ;;  %v994_v32 = vadd.f32 %v957_v45, %v3777_v27  ;;  %v1379_v36 = vmul.f32 %v3443_v22, %v1347_v50  ;;  %v1598_v50 = vld [vmem:[#allocation3 + $0x98] sm:$0xff] }
 0x2b7   : > { %1438 = vrot.lane.b32.xlu1 %v1364_v11, %s2540_s9  ;;  %v1676_v40 = vpop.permute.xlu0 %1675  ;;  %v1383_v43 = vmul.f32 %v3489_v12, %v1351_v16  ;;  %v1384_v19 = vmul.f32 %v3500_v23, %v1352_v61  ;;  %v1914_v23 = vld [vmem:[#allocation3 + $0x8] sm:$0xff]  ;;  %v1921_v16 = vld [vmem:[#allocation3 + $0x40] sm:$0xff]  ;;  %v1601_v61 = vld [vmem:[#allocation3 + $0xb0] sm:$0xff] }
 0x2b8   : > { %v1755_v18 = vadd.f32 %v1676_v40, %v1595_v38  ;;  %v1348_v11 = vsub.f32 %v994_v32, %v3779_v49  ;;  %v961_v38 = vmul.f32 0.6931472, %v2476_v42  ;;  %v3780_v40 = vld [vmem:[#allocation17_spill] sm:$0xff]  ;;  %v1946_v45 = vsel %vm257_vm1, %v1914_v23, 0.0 }
 0x2ba   : > { %1787 = vst.msk [vmem:[#allocation3 + $0x80] sm:$0xff] %vm257_vm1, %v1755_v18  ;;  %v1349_v18 = vsub.f32 %v995_v8, %v3780_v40  ;;  %v996_v58 = vadd.f32 %v961_v38, %v3781_v1  ;;  %v1380_v25 = vmul.f32 %v3454_v59, %v1348_v11  ;;  %v1950_v8 = vsel %vm257_vm1, %v1916_v33, 0.0  ;;  %v1292_v11 = vld [vmem:[#allocation2 + $0x10] sm:$0xff] }
 0x2bb   : > { %1444 = vrot.lane.b32.xlu1 %v1367_v41, %s2540_s9  ;;  %v1919_v1 = vld [vmem:[#allocation3 + $0x30] sm:$0xff] }
 0x2bc   : > { %v1350_v41 = vsub.f32 %v996_v58, %v3783_v4  ;;  %v1381_v22 = vmul.f32 %v3466_v44, %v1349_v18  ;;  %v3788_v44 = vld [vmem:[#allocation19_spill] sm:$0xff] }
 0x2be   : > { %v1382_v59 = vmul.f32 %v3478_v48, %v1350_v41  ;;  %v1920_v41 = vld [vmem:[#allocation3 + $0x38] sm:$0xff] }
 0x2bf   : > { %1442 = vrot.lane.b32.xlu1 %v1366_v63, %s2540_s9  ;;  %v3786_v63 = vld [vmem:[#allocation14_spill] sm:$0xff]  ;;  %v1958_v46 = vsel %vm257_vm1, %v1920_v41, 0.0 }
 0x2c0   : > { %v999_v53 = vadd.f32 %v967_v10, %v3786_v63  ;;  %v1295_v63 = vld [vmem:[#allocation2 + $0x28] sm:$0xff] }
 0x2c2   : > { %v1353_v26 = vsub.f32 %v999_v53, %v3788_v44 }
 0x2c3   : > { %1448 = vrot.lane.b32.xlu1 %v1369_v60, %s2540_s9 }
 0x2c4   : > { %v1385_v60 = vmul.f32 %v3511_v39, %v1353_v26 }
 0x2c7   : > { %1446 = vrot.lane.b32.xlu1 %v1368_v20, %s2540_s9  ;;  %v1913_v20 = vld [vmem:[#allocation3] sm:$0xff] }
 0x2c8   : > { %v1945_v52 = vsel %vm257_vm1, %v1913_v20, 0.0  ;;  %v1925_v20 = vld [vmem:[#allocation3 + $0x60] sm:$0xff] }
 0x2c9   : > { %v1947_v32 = vadd.f32 %v1946_v45, %v1945_v52  ;;  %v1926_v52 = vld [vmem:[#allocation3 + $0x68] sm:$0xff]  ;;  %v1603_v45 = vld [vmem:[#allocation3 + $0xc0] sm:$0xff] }
 0x2cb   : > { %1464 = vrot.lane.b32.xlu1 %v1377_v0, %s2540_s9  ;;  %v1949_v38 = vadd.f32 %v1948_v28, %v1947_v32  ;;  %v1970_v32 = vsel %vm257_vm1, %v1926_v52, 0.0 }
 0x2cd   : > { %v1951_v14 = vadd.f32 %v1950_v8, %v1949_v38  ;;  %v1928_v8 = vld [vmem:[#allocation3 + $0x78] sm:$0xff] }
 0x2cf   : > { %1466 = vrot.lane.b32.xlu1 %v1378_v5, %s2540_s9  ;;  %v1917_v5 = vld [vmem:[#allocation3 + $0x20] sm:$0xff] }
 0x2d0   : > { %v1952_v40 = vsel %vm257_vm1, %v1917_v5, 0.0 }
 0x2d1   : > { %v1953_v4 = vadd.f32 %v1952_v40, %v1951_v14 }
 0x2d3   : > { %1468 = vrot.lane.b32.xlu1 %v1379_v36, %s2540_s9  ;;  %v1918_v36 = vld [vmem:[#allocation3 + $0x28] sm:$0xff] }
 0x2d4   : > { %v1954_v47 = vsel %vm257_vm1, %v1918_v36, 0.0 }
 0x2d5   : > { %v1955_v30 = vadd.f32 %v1954_v47, %v1953_v4 }
 0x2d7   : > { %1470 = vrot.lane.b32.xlu1 %v1380_v25, %s2540_s9 }
 0x2db   : > { %1472 = vrot.lane.b32.xlu1 %v1381_v22, %s2540_s9  ;;  %v1956_v22 = vsel %vm257_vm1, %v1919_v1, 0.0  ;;  %v1297_v1 = vld [vmem:[#allocation2 + $0x38] sm:$0xff] }
 0x2dc   : > { %v1957_v53 = vadd.f32 %v1956_v22, %v1955_v30 }
 0x2de   : > { %v1959_v26 = vadd.f32 %v1958_v46, %v1957_v53 }
 0x2df   : > { %1474 = vrot.lane.b32.xlu1 %v1382_v59, %s2540_s9 }
 0x2e3   : > { %1476 = vrot.lane.b32.xlu1 %v1383_v43, %s2540_s9  ;;  %v1960_v43 = vsel %vm257_vm1, %v1921_v16, 0.0  ;;  %v1296_v16 = vld [vmem:[#allocation2 + $0x30] sm:$0xff] }
 0x2e7   : > { %1478 = vrot.lane.b32.xlu1 %v1384_v19, %s2540_s9  ;;  %v1923_v19 = vld [vmem:[#allocation3 + $0x50] sm:$0xff] }
 0x2e9   : > { %v1419_v48 = vpop.permute.xlu0 %1418 }
 0x2ea   : > { %v1514_v31 = vadd.f32 %v1419_v48, %v1290_v37  ;;  %v1962_v48 = vsel %vm257_vm1, %v1922_v54, 0.0 }
 0x2eb   : > { %1480 = vrot.lane.b32.xlu1 %v1385_v60, %s2540_s9 }
 0x2ec   : > { %1547 = vst.msk [vmem:[#allocation2] sm:$0xff] %vm257_vm1, %v1514_v31 }
 0x2ed   : > { %v1451_v12 = vpop.permute.xlu1 %1450  ;;  %v1678_v57 = vpop.permute.xlu0 %1677 }
 0x2ee   : > { %v1530_v35 = vadd.f32 %v1451_v12, %v1306_v56  ;;  %v1756_v15 = vadd.f32 %v1678_v57, %v1596_v51  ;;  %v1311_v56 = vld [vmem:[#allocation2 + $0xa8] sm:$0xff]  ;;  %v1961_v51 = vadd.f32 %v1960_v43, %v1959_v26  ;;  %v1924_v12 = vld [vmem:[#allocation3 + $0x58] sm:$0xff]  ;;  %v1964_v57 = vsel %vm257_vm1, %v1923_v19, 0.0  ;;  %v1312_v19 = vld [vmem:[#allocation2 + $0xb0] sm:$0xff] }
 0x2f0   : > { %1563 = vst.msk [vmem:[#allocation2 + $0x80] sm:$0xff] %vm257_vm1, %v1530_v35  ;;  %1788 = vst.msk [vmem:[#allocation3 + $0x88] sm:$0xff] %vm257_vm1, %v1756_v15  ;;  %v1602_v35 = vld [vmem:[#allocation3 + $0xb8] sm:$0xff] }
 0x2f1   : > { %v1425_v39 = vpop.permute.xlu1 %1424  ;;  %v1680_v7 = vpop.permute.xlu0 %1679 }
 0x2f2   : > { %v1517_v17 = vadd.f32 %v1425_v39, %v1293_v34  ;;  %v1757_v0 = vadd.f32 %v1680_v7, %v1597_v9  ;;  %v1963_v34 = vadd.f32 %v1962_v48, %v1961_v51  ;;  %v1966_v39 = vsel %vm257_vm1, %v1924_v12, 0.0 }
 0x2f4   : > { %1550 = vst.msk [vmem:[#allocation2 + $0x18] sm:$0xff] %vm257_vm1, %v1517_v17  ;;  %1789 = vst.msk [vmem:[#allocation3 + $0x90] sm:$0xff] %vm257_vm1, %v1757_v0  ;;  %v1294_v17 = vld [vmem:[#allocation2 + $0x20] sm:$0xff]  ;;  %v1965_v7 = vadd.f32 %v1964_v57, %v1963_v34  ;;  %v1968_v0 = vsel %vm257_vm1, %v1925_v20, 0.0  ;;  %v1807_v20 = vld [vmem:[#allocation2 + $0x8] sm:$0xff] }
 0x2f5   : > { %v1457_v27 = vpop.permute.xlu1 %1456  ;;  %v1682_v62 = vpop.permute.xlu0 %1681 }
 0x2f6   : > { %v1533_v42 = vadd.f32 %v1457_v27, %v1309_v3  ;;  %v1758_v49 = vadd.f32 %v1682_v62, %v1598_v50  ;;  %v1967_v33 = vadd.f32 %v1966_v39, %v1965_v7  ;;  %v1927_v50 = vld [vmem:[#allocation3 + $0x70] sm:$0xff]  ;;  %v1299_v39 = vld [vmem:[#allocation2 + $0x48] sm:$0xff] }
 0x2f7   : > { %v1930_v47 = vld [vmem:[#allocation3 + $0x88] sm:$0xff] }
 0x2f8   : > { %1566 = vst.msk [vmem:[#allocation2 + $0x98] sm:$0xff] %vm257_vm1, %v1533_v42  ;;  %1790 = vst.msk [vmem:[#allocation3 + $0x98] sm:$0xff] %vm257_vm1, %v1758_v49  ;;  %v1310_v42 = vld [vmem:[#allocation2 + $0xa0] sm:$0xff]  ;;  %v1969_v62 = vadd.f32 %v1968_v0, %v1967_v33  ;;  %v1604_v49 = vld [vmem:[#allocation3 + $0xc8] sm:$0xff]  ;;  %v1839_v33 = vsel %vm257_vm1, %v1807_v20, 0.0 }
 0x2f9   : > { %v1423_v18 = vpop.permute.xlu1 %1422  ;;  %v1684_v25 = vpop.permute.xlu0 %1683  ;;  %v1608_v7 = vld [vmem:[#allocation3 + $0xe8] sm:$0xff] }
 0x2fa   : > { %v1516_v58 = vadd.f32 %v1423_v18, %v1292_v11  ;;  %v1759_v29 = vadd.f32 %v1684_v25, %v1599_v24  ;;  %v1972_v11 = vsel %vm257_vm1, %v1927_v50, 0.0  ;;  %v1971_v36 = vadd.f32 %v1970_v32, %v1969_v62  ;;  %v1929_v18 = vld [vmem:[#allocation3 + $0x80] sm:$0xff]  ;;  %v1605_v25 = vld [vmem:[#allocation3 + $0xd0] sm:$0xff] }
 0x2fb   : > { %v1976_v4 = vsel %vm257_vm1, %v1929_v18, 0.0  ;;  %v1931_v22 = vld [vmem:[#allocation3 + $0x90] sm:$0xff] }
 0x2fc   : > { %1549 = vst.msk [vmem:[#allocation2 + $0x10] sm:$0xff] %vm257_vm1, %v1516_v58  ;;  %1791 = vst.msk [vmem:[#allocation3 + $0xa0] sm:$0xff] %vm257_vm1, %v1759_v29  ;;  %v1974_v58 = vsel %vm257_vm1, %v1928_v8, 0.0  ;;  %v1973_v29 = vadd.f32 %v1972_v11, %v1971_v36  ;;  %v1980_v53 = vsel %vm257_vm1, %v1931_v22, 0.0  ;;  %v1298_v8 = vld [vmem:[#allocation2 + $0x40] sm:$0xff]  ;;  %v1609_v11 = vld [vmem:[#allocation3 + $0xf0] sm:$0xff] }
 0x2fd   : > { %v1455_v13 = vpop.permute.xlu1 %1454  ;;  %v1686_v21 = vpop.permute.xlu0 %1685 }
 0x2fe   : > { %v1532_v10 = vadd.f32 %v1455_v13, %v1308_v6  ;;  %v1760_v59 = vadd.f32 %v1686_v21, %v1600_v2  ;;  %v1975_v13 = vadd.f32 %v1974_v58, %v1973_v29  ;;  %v1606_v21 = vld [vmem:[#allocation3 + $0xd8] sm:$0xff] }
 0x2ff   : > { %v1932_v46 = vld [vmem:[#allocation3 + $0x98] sm:$0xff] }
 0x300   : > { %1565 = vst.msk [vmem:[#allocation2 + $0x90] sm:$0xff] %vm257_vm1, %v1532_v10  ;;  %1792 = vst.msk [vmem:[#allocation3 + $0xa8] sm:$0xff] %vm257_vm1, %v1760_v59  ;;  %v1978_v10 = vsel %vm257_vm1, %v1930_v47, 0.0  ;;  %v1977_v59 = vadd.f32 %v1976_v4, %v1975_v13  ;;  %v1301_v4 = vld [vmem:[#allocation2 + $0x58] sm:$0xff] }
 0x301   : > { %v1429_v44 = vpop.permute.xlu1 %1428  ;;  %v1688_v60 = vpop.permute.xlu0 %1687  ;;  %v1610_v13 = vld [vmem:[#allocation3 + $0xf8] sm:$0xff] }
 0x302   : > { %v1519_v37 = vadd.f32 %v1429_v44, %v1295_v63  ;;  %v1761_v31 = vadd.f32 %v1688_v60, %v1601_v61  ;;  %v1979_v44 = vadd.f32 %v1978_v10, %v1977_v59  ;;  %v1607_v60 = vld [vmem:[#allocation3 + $0xe0] sm:$0xff] }
 0x303   : > { %v1933_v43 = vld [vmem:[#allocation3 + $0xa0] sm:$0xff] }
 0x304   : > { %1552 = vst.msk [vmem:[#allocation2 + $0x28] sm:$0xff] %vm257_vm1, %v1519_v37  ;;  %1793 = vst.msk [vmem:[#allocation3 + $0xb0] sm:$0xff] %vm257_vm1, %v1761_v31  ;;  %v1982_v37 = vsel %vm257_vm1, %v1932_v46, 0.0  ;;  %v1981_v31 = vadd.f32 %v1980_v53, %v1979_v44  ;;  %v1984_v12 = vsel %vm257_vm1, %v1933_v43, 0.0 }
 0x305   : > { %v1461_v15 = vpop.permute.xlu1 %1460  ;;  %v1690_v9 = vpop.permute.xlu0 %1689 }
 0x306   : > { %v1535_v23 = vadd.f32 %v1461_v15, %v1311_v56  ;;  %v1762_v55 = vadd.f32 %v1690_v9, %v1602_v35  ;;  %v1806_v56 = vld [vmem:[#allocation2] sm:$0xff]  ;;  %v1983_v34 = vadd.f32 %v1982_v37, %v1981_v31 }
 0x307   : > { %v1934_v48 = vld [vmem:[#allocation3 + $0xa8] sm:$0xff] }
 0x308   : > { %1568 = vst.msk [vmem:[#allocation2 + $0xa8] sm:$0xff] %vm257_vm1, %v1535_v23  ;;  %1794 = vst.msk [vmem:[#allocation3 + $0xb8] sm:$0xff] %vm257_vm1, %v1762_v55  ;;  %v1808_v23 = vld [vmem:[#allocation2 + $0x10] sm:$0xff]  ;;  %v1986_v55 = vsel %vm257_vm1, %v1934_v48, 0.0 }
 0x309   : > { %v1427_v3 = vpop.permute.xlu1 %1426  ;;  %v1692_v27 = vpop.permute.xlu0 %1691  ;;  %v1841_v50 = vsel %vm257_vm1, %v1808_v23, 0.0 }
 0x30a   : > { %v1518_v28 = vadd.f32 %v1427_v3, %v1294_v17  ;;  %v1763_v5 = vadd.f32 %v1692_v27, %v1603_v45  ;;  %v1838_v17 = vsel %vm257_vm1, %v1806_v56, 0.0  ;;  %v1985_v45 = vadd.f32 %v1984_v12, %v1983_v34  ;;  %v1303_v34 = vld [vmem:[#allocation2 + $0x68] sm:$0xff] }
 0x30b   : > { %v1935_v15 = vld [vmem:[#allocation3 + $0xb0] sm:$0xff] }
 0x30c   : > { %1551 = vst.msk [vmem:[#allocation2 + $0x20] sm:$0xff] %vm257_vm1, %v1518_v28  ;;  %1795 = vst.msk [vmem:[#allocation3 + $0xc0] sm:$0xff] %vm257_vm1, %v1763_v5  ;;  %v1988_v3 = vsel %vm257_vm1, %v1935_v15, 0.0  ;;  %v1987_v5 = vadd.f32 %v1986_v55, %v1985_v45 }
 0x30d   : > { %v1459_v38 = vpop.permute.xlu1 %1458  ;;  %v1694_v40 = vpop.permute.xlu0 %1693 }
 0x30e   : > { %v1534_v24 = vadd.f32 %v1459_v38, %v1310_v42  ;;  %v1764_v14 = vadd.f32 %v1694_v40, %v1604_v49  ;;  %v1840_v42 = vadd.f32 %v1839_v33, %v1838_v17  ;;  %v1989_v36 = vadd.f32 %v1988_v3, %v1987_v5  ;;  %v1302_v3 = vld [vmem:[#allocation2 + $0x60] sm:$0xff] }
 0x30f   : > { %v1936_v52 = vld [vmem:[#allocation3 + $0xb8] sm:$0xff] }
 0x310   : > { %1567 = vst.msk [vmem:[#allocation2 + $0xa0] sm:$0xff] %vm257_vm1, %v1534_v24  ;;  %1796 = vst.msk [vmem:[#allocation3 + $0xc8] sm:$0xff] %vm257_vm1, %v1764_v14  ;;  %v1990_v49 = vsel %vm257_vm1, %v1936_v52, 0.0  ;;  %v1809_v24 = vld [vmem:[#allocation2 + $0x18] sm:$0xff]  ;;  %v1842_v40 = vadd.f32 %v1841_v50, %v1840_v42 }
 0x311   : > { %v1433_v6 = vpop.permute.xlu1 %1432  ;;  %v1696_v2 = vpop.permute.xlu0 %1695  ;;  %v1991_v29 = vadd.f32 %v1990_v49, %v1989_v36  ;;  %v1305_v36 = vld [vmem:[#allocation2 + $0x78] sm:$0xff] }
 0x312   : > { %v1521_v41 = vadd.f32 %v1433_v6, %v1297_v1  ;;  %v1765_v30 = vadd.f32 %v1696_v2, %v1605_v25  ;;  %v1843_v2 = vsel %vm257_vm1, %v1809_v24, 0.0 }
 0x313   : > { %v1937_v32 = vld [vmem:[#allocation3 + $0xc0] sm:$0xff]  ;;  %v1844_v10 = vadd.f32 %v1843_v2, %v1842_v40 }
 0x314   : > { %1554 = vst.msk [vmem:[#allocation2 + $0x38] sm:$0xff] %vm257_vm1, %v1521_v41  ;;  %1797 = vst.msk [vmem:[#allocation3 + $0xd0] sm:$0xff] %vm257_vm1, %v1765_v30  ;;  %v1810_v18 = vld [vmem:[#allocation2 + $0x20] sm:$0xff]  ;;  %v1992_v1 = vsel %vm257_vm1, %v1937_v32, 0.0 }
 0x315   : > { %v1431_v63 = vpop.permute.xlu1 %1430  ;;  %v1698_v61 = vpop.permute.xlu0 %1697  ;;  %v1845_v22 = vsel %vm257_vm1, %v1810_v18, 0.0 }
 0x316   : > { %v1520_v54 = vadd.f32 %v1431_v63, %v1296_v16  ;;  %v1766_v26 = vadd.f32 %v1698_v61, %v1606_v21  ;;  %v1993_v16 = vadd.f32 %v1992_v1, %v1991_v29  ;;  %v1811_v61 = vld [vmem:[#allocation2 + $0x28] sm:$0xff]  ;;  %v1846_v43 = vadd.f32 %v1845_v22, %v1844_v10 }
 0x317   : > { %v1938_v38 = vld [vmem:[#allocation3 + $0xc8] sm:$0xff] }
 0x318   : > { %1553 = vst.msk [vmem:[#allocation2 + $0x30] sm:$0xff] %vm257_vm1, %v1520_v54  ;;  %1798 = vst.msk [vmem:[#allocation3 + $0xd8] sm:$0xff] %vm257_vm1, %v1766_v26  ;;  %v1994_v41 = vsel %vm257_vm1, %v1938_v38, 0.0 }
 0x319   : > { %v1463_v51 = vpop.permute.xlu1 %1462  ;;  %v1700_v57 = vpop.permute.xlu0 %1699  ;;  %v1995_v54 = vadd.f32 %v1994_v41, %v1993_v16  ;;  %v1313_v41 = vld [vmem:[#allocation2 + $0xb8] sm:$0xff] }
 0x31a   : > { %v1536_v35 = vadd.f32 %v1463_v51, %v1312_v19  ;;  %v1767_v9 = vadd.f32 %v1700_v57, %v1607_v60  ;;  %v1300_v19 = vld [vmem:[#allocation2 + $0x50] sm:$0xff]  ;;  %v1847_v51 = vsel %vm257_vm1, %v1811_v61, 0.0 }
 0x31b   : > { %v1939_v47 = vld [vmem:[#allocation3 + $0xd0] sm:$0xff]  ;;  %v1848_v15 = vadd.f32 %v1847_v51, %v1846_v43  ;;  %v1315_v43 = vld [vmem:[#allocation2 + $0xc8] sm:$0xff] }
 0x31c   : > { %1569 = vst.msk [vmem:[#allocation2 + $0xb0] sm:$0xff] %vm257_vm1, %v1536_v35  ;;  %1799 = vst.msk [vmem:[#allocation3 + $0xe0] sm:$0xff] %vm257_vm1, %v1767_v9  ;;  %v1996_v46 = vsel %vm257_vm1, %v1939_v47, 0.0  ;;  %v1823_v51 = vld [vmem:[#allocation2 + $0x88] sm:$0xff] }
 0x31d   : > { %v1437_v0 = vpop.permute.xlu1 %1436  ;;  %v1702_v27 = vpop.permute.xlu0 %1701  ;;  %v1997_v48 = vadd.f32 %v1996_v46, %v1995_v54  ;;  %v1314_v46 = vld [vmem:[#allocation2 + $0xc0] sm:$0xff] }
 0x31e   : > { %v1523_v28 = vadd.f32 %v1437_v0, %v1299_v39  ;;  %v1768_v62 = vadd.f32 %v1702_v27, %v1608_v7  ;;  %v1813_v39 = vld [vmem:[#allocation2 + $0x38] sm:$0xff] }
 0x31f   : > { %v1940_v30 = vld [vmem:[#allocation3 + $0xd8] sm:$0xff]  ;;  %v1812_v44 = vld [vmem:[#allocation2 + $0x30] sm:$0xff]  ;;  %v1851_v33 = vsel %vm257_vm1, %v1813_v39, 0.0 }
 0x320   : > { %1556 = vst.msk [vmem:[#allocation2 + $0x48] sm:$0xff] %vm257_vm1, %v1523_v28  ;;  %1800 = vst.msk [vmem:[#allocation3 + $0xe8] sm:$0xff] %vm257_vm1, %v1768_v62  ;;  %v1998_v37 = vsel %vm257_vm1, %v1940_v30, 0.0  ;;  %v1849_v12 = vsel %vm257_vm1, %v1812_v44, 0.0  ;;  %v1825_v39 = vld [vmem:[#allocation2 + $0x98] sm:$0xff] }
 0x321   : > { %v1435_v14 = vpop.permute.xlu1 %1434  ;;  %v1704_v25 = vpop.permute.xlu0 %1703  ;;  %v1999_v57 = vadd.f32 %v1998_v37, %v1997_v48  ;;  %v1850_v55 = vadd.f32 %v1849_v12, %v1848_v15  ;;  %v1822_v37 = vld [vmem:[#allocation2 + $0x80] sm:$0xff]  ;;  %v1824_v15 = vld [vmem:[#allocation2 + $0x90] sm:$0xff] }
 0x322   : > { %v1522_v58 = vadd.f32 %v1435_v14, %v1298_v8  ;;  %v1769_v6 = vadd.f32 %v1704_v25, %v1609_v11 }
 0x323   : > { %v1941_v53 = vld [vmem:[#allocation3 + $0xe0] sm:$0xff]  ;;  %v1852_v32 = vadd.f32 %v1851_v33, %v1850_v55 }
 0x324   : > { %1555 = vst.msk [vmem:[#allocation2 + $0x40] sm:$0xff] %vm257_vm1, %v1522_v58  ;;  %1801 = vst.msk [vmem:[#allocation3 + $0xf0] sm:$0xff] %vm257_vm1, %v1769_v6  ;;  %v2000_v56 = vsel %vm257_vm1, %v1941_v53, 0.0  ;;  %v1304_v58 = vld [vmem:[#allocation2 + $0x70] sm:$0xff]  ;;  %v1318_v33 = vld [vmem:[#allocation2 + $0xe0] sm:$0xff] }
 0x325   : > { %v1441_v21 = vpop.permute.xlu1 %1440  ;;  %v1706_v63 = vpop.permute.xlu0 %1705  ;;  %v2001_v9 = vadd.f32 %v2000_v56, %v1999_v57  ;;  %v1316_v56 = vld [vmem:[#allocation2 + $0xd0] sm:$0xff] }
 0x326   : > { %v1525_v59 = vadd.f32 %v1441_v21, %v1301_v4  ;;  %v1770_v26 = vadd.f32 %v1706_v63, %v1610_v13 }
 0x327   : > { %v1942_v60 = vld [vmem:[#allocation3 + $0xe8] sm:$0xff] }
 0x328   : > { %1558 = vst.msk [vmem:[#allocation2 + $0x58] sm:$0xff] %vm257_vm1, %v1525_v59  ;;  %1802 = vst.msk [vmem:[#allocation3 + $0xf8] sm:$0xff] %vm257_vm1, %v1770_v26  ;;  %v2002_v20 = vsel %vm257_vm1, %v1942_v60, 0.0  ;;  %v1815_v49 = vld [vmem:[#allocation2 + $0x48] sm:$0xff] }
 0x329   : > { %v1439_v31 = vpop.permute.xlu1 %1438  ;;  %v2003_v0 = vadd.f32 %v2002_v20, %v2001_v9  ;;  %v1855_v40 = vsel %vm257_vm1, %v1815_v49, 0.0  ;;  %v1317_v9 = vld [vmem:[#allocation2 + $0xd8] sm:$0xff]  ;;  %v1319_v49 = vld [vmem:[#allocation2 + $0xe8] sm:$0xff] }
 0x32a   : > { %v1524_v35 = vadd.f32 %v1439_v31, %v1300_v19 }
 0x32b   : > { %v1943_v23 = vld [vmem:[#allocation3 + $0xf0] sm:$0xff]  ;;  %v1814_v17 = vld [vmem:[#allocation2 + $0x40] sm:$0xff] }
 0x32c   : > { %1557 = vst.msk [vmem:[#allocation2 + $0x50] sm:$0xff] %vm257_vm1, %v1524_v35  ;;  %v2004_v52 = vsel %vm257_vm1, %v1943_v23, 0.0  ;;  %v1853_v50 = vsel %vm257_vm1, %v1814_v17, 0.0  ;;  %v1869_v35 = vsel %vm257_vm1, %v1822_v37, 0.0  ;;  %v1871_v23 = vsel %vm257_vm1, %v1823_v51, 0.0 }
 0x32d   : > { %v1445_v7 = vpop.permute.xlu1 %1444  ;;  %v2005_v27 = vadd.f32 %v2004_v52, %v2003_v0  ;;  %v1854_v11 = vadd.f32 %v1853_v50, %v1852_v32  ;;  %v1873_v17 = vsel %vm257_vm1, %v1824_v15, 0.0  ;;  %v1826_v52 = vld [vmem:[#allocation2 + $0xa0] sm:$0xff]  ;;  %v1827_v50 = vld [vmem:[#allocation2 + $0xa8] sm:$0xff] }
 0x32e   : > { %v1527_v45 = vadd.f32 %v1445_v7, %v1303_v34 }
 0x32f   : > { %v1944_v28 = vld [vmem:[#allocation3 + $0xf8] sm:$0xff]  ;;  %v1856_v1 = vadd.f32 %v1855_v40, %v1854_v11 }
 0x330   : > { %1560 = vst.msk [vmem:[#allocation2 + $0x68] sm:$0xff] %vm257_vm1, %v1527_v45  ;;  %v2006_v42 = vsel %vm257_vm1, %v1944_v28, 0.0  ;;  %v1817_v25 = vld [vmem:[#allocation2 + $0x58] sm:$0xff] }
 0x331   : > { %v1443_v5 = vpop.permute.xlu1 %1442  ;;  %v2007_v8 = vadd.f32 %v2006_v42, %v2005_v27  ;;  %v1859_v2 = vsel %vm257_vm1, %v1817_v25, 0.0  ;;  %v1877_v27 = vsel %vm257_vm1, %v1826_v52, 0.0 }
 0x332   : > { %v1526_v62 = vadd.f32 %v1443_v5, %v1302_v3  ;;  %v1875_v3 = vsel %vm257_vm1, %v1825_v39, 0.0  ;;  %v1828_v5 = vld [vmem:[#allocation2 + $0xb0] sm:$0xff] }
 0x333   : > { %v1816_v38 = vld [vmem:[#allocation2 + $0x50] sm:$0xff]  ;;  %2008 = vadd.xlane.f32.xlu0 %v2007_v8  ;;  %v1879_v8 = vsel %vm257_vm1, %v1827_v50, 0.0 }
 0x334   : > { %1559 = vst.msk [vmem:[#allocation2 + $0x60] sm:$0xff] %vm257_vm1, %v1526_v62  ;;  %v1857_v18 = vsel %vm257_vm1, %v1816_v38, 0.0 }
 0x335   : > { %v1449_v24 = vpop.permute.xlu1 %1448  ;;  %v1858_v47 = vadd.f32 %v1857_v18, %v1856_v1 }
 0x336   : > { %v1529_v14 = vadd.f32 %v1449_v24, %v1305_v36  ;;  %v1881_v36 = vsel %vm257_vm1, %v1828_v5, 0.0 }
 0x337   : > { %v1860_v13 = vadd.f32 %v1859_v2, %v1858_v47  ;;  %v1819_v10 = vld [vmem:[#allocation2 + $0x68] sm:$0xff] }
 0x338   : > { %1562 = vst.msk [vmem:[#allocation2 + $0x78] sm:$0xff] %vm257_vm1, %v1529_v14  ;;  %v1863_v63 = vsel %vm257_vm1, %v1819_v10, 0.0 }
 0x339   : > { %v1447_v29 = vpop.permute.xlu1 %1446 }
 0x33a   : > { %v1528_v6 = vadd.f32 %v1447_v29, %v1304_v58  ;;  %v1320_v58 = vld [vmem:[#allocation2 + $0xf0] sm:$0xff] }
 0x33b   : > { %v1818_v4 = vld [vmem:[#allocation2 + $0x60] sm:$0xff] }
 0x33c   : > { %v1861_v22 = vsel %vm257_vm1, %v1818_v4, 0.0  ;;  %1561 = vst.msk [vmem:[#allocation2 + $0x70] sm:$0xff] %vm257_vm1, %v1528_v6 }
 0x33d   : > { %v1465_v30 = vpop.permute.xlu1 %1464  ;;  %v1862_v21 = vadd.f32 %v1861_v22, %v1860_v13  ;;  %v1321_v13 = vld [vmem:[#allocation2 + $0xf8] sm:$0xff] }
 0x33e   : > { %v1537_v16 = vadd.f32 %v1465_v30, %v1313_v41 }
 0x33f   : > { %v1821_v54 = vld [vmem:[#allocation2 + $0x78] sm:$0xff]  ;;  %v1864_v44 = vadd.f32 %v1863_v63, %v1862_v21 }
 0x340   : > { %1570 = vst.msk [vmem:[#allocation2 + $0xb8] sm:$0xff] %vm257_vm1, %v1537_v16  ;;  %v1867_v31 = vsel %vm257_vm1, %v1821_v54, 0.0 }
 0x341   : > { %v1467_v59 = vpop.permute.xlu1 %1466 }
 0x342   : > { %v1538_v53 = vadd.f32 %v1467_v59, %v1314_v46 }
 0x343   : > { %v1820_v61 = vld [vmem:[#allocation2 + $0x70] sm:$0xff] }
 0x344   : > { %v1865_v26 = vsel %vm257_vm1, %v1820_v61, 0.0  ;;  %1571 = vst.msk [vmem:[#allocation2 + $0xc0] sm:$0xff] %vm257_vm1, %v1538_v53 }
 0x345   : > { %v1469_v19 = vpop.permute.xlu1 %1468  ;;  %v1866_v60 = vadd.f32 %v1865_v26, %v1864_v44 }
 0x346   : > { %v1539_v48 = vadd.f32 %v1469_v19, %v1315_v43 }
 0x347   : > { %v1868_v12 = vadd.f32 %v1867_v31, %v1866_v60  ;;  %v1829_v11 = vld [vmem:[#allocation2 + $0xb8] sm:$0xff] }
 0x348   : > { %1572 = vst.msk [vmem:[#allocation2 + $0xc8] sm:$0xff] %vm257_vm1, %v1539_v48  ;;  %v1883_v1 = vsel %vm257_vm1, %v1829_v11, 0.0 }
 0x349   : > { %v1471_v57 = vpop.permute.xlu1 %1470  ;;  %v1870_v34 = vadd.f32 %v1869_v35, %v1868_v12 }
 0x34a   : > { %v1540_v20 = vadd.f32 %v1471_v57, %v1316_v56 }
 0x34b   : > { %v1872_v55 = vadd.f32 %v1871_v23, %v1870_v34  ;;  %v1830_v40 = vld [vmem:[#allocation2 + $0xc0] sm:$0xff] }
 0x34c   : > { %1573 = vst.msk [vmem:[#allocation2 + $0xd0] sm:$0xff] %vm257_vm1, %v1540_v20  ;;  %v1885_v29 = vsel %vm257_vm1, %v1830_v40, 0.0 }
 0x34d   : > { %v1473_v7 = vpop.permute.xlu1 %1472  ;;  %v1874_v45 = vadd.f32 %v1873_v17, %v1872_v55 }
 0x34e   : > { %v1541_v0 = vadd.f32 %v1473_v7, %v1317_v9 }
 0x34f   : > { %v1876_v28 = vadd.f32 %v1875_v3, %v1874_v45  ;;  %v1831_v25 = vld [vmem:[#allocation2 + $0xc8] sm:$0xff] }
 0x350   : > { %1574 = vst.msk [vmem:[#allocation2 + $0xd8] sm:$0xff] %vm257_vm1, %v1541_v0  ;;  %v1887_v22 = vsel %vm257_vm1, %v1831_v25, 0.0 }
 0x351   : > { %v1475_v32 = vpop.permute.xlu1 %1474  ;;  %v1878_v42 = vadd.f32 %v1877_v27, %v1876_v28 }
 0x352   : > { %v1542_v62 = vadd.f32 %v1475_v32, %v1318_v33 }
 0x353   : > { %v1880_v38 = vadd.f32 %v1879_v8, %v1878_v42  ;;  %v1832_v4 = vld [vmem:[#allocation2 + $0xd0] sm:$0xff] }
 0x354   : > { %1575 = vst.msk [vmem:[#allocation2 + $0xe0] sm:$0xff] %vm257_vm1, %v1542_v62  ;;  %v1889_v10 = vsel %vm257_vm1, %v1832_v4, 0.0 }
 0x355   : > { %v1477_v24 = vpop.permute.xlu1 %1476  ;;  %v1882_v18 = vadd.f32 %v1881_v36, %v1880_v38 }
 0x356   : > { %v1543_v14 = vadd.f32 %v1477_v24, %v1319_v49 }
 0x357   : > { %v1884_v47 = vadd.f32 %v1883_v1, %v1882_v18  ;;  %v1833_v30 = vld [vmem:[#allocation2 + $0xd8] sm:$0xff] }
 0x358   : > { %1576 = vst.msk [vmem:[#allocation2 + $0xe8] sm:$0xff] %vm257_vm1, %v1543_v14  ;;  %v1891_v53 = vsel %vm257_vm1, %v1833_v30, 0.0 }
 0x359   : > { %v1479_v6 = vpop.permute.xlu1 %1478  ;;  %v1886_v41 = vadd.f32 %v1885_v29, %v1884_v47 }
 0x35a   : > { %v1544_v2 = vadd.f32 %v1479_v6, %v1320_v58 }
 0x35b   : > { %v1888_v16 = vadd.f32 %v1887_v22, %v1886_v41  ;;  %v1834_v46 = vld [vmem:[#allocation2 + $0xe0] sm:$0xff] }
 0x35c   : > { %1577 = vst.msk [vmem:[#allocation2 + $0xf0] sm:$0xff] %vm257_vm1, %v1544_v2  ;;  %v1893_v43 = vsel %vm257_vm1, %v1834_v46, 0.0 }
 0x35d   : > { %v1481_v21 = vpop.permute.xlu1 %1480  ;;  %v1890_v59 = vadd.f32 %v1889_v10, %v1888_v16 }
 0x35e   : > { %v1545_v63 = vadd.f32 %v1481_v21, %v1321_v13 }
 0x35f   : > { %v1835_v54 = vld [vmem:[#allocation2 + $0xe8] sm:$0xff]  ;;  %v1892_v61 = vadd.f32 %v1891_v53, %v1890_v59 }
 0x360   : > { %1578 = vst.msk [vmem:[#allocation2 + $0xf8] sm:$0xff] %vm257_vm1, %v1545_v63  ;;  %v1895_v26 = vsel %vm257_vm1, %v1835_v54, 0.0 }
 0x361   : > { %v1894_v44 = vadd.f32 %v1893_v43, %v1892_v61 }
 0x363   : > { %v1836_v19 = vld [vmem:[#allocation2 + $0xf0] sm:$0xff]  ;;  %v1896_v37 = vadd.f32 %v1895_v26, %v1894_v44 }
 0x364   : > { %v1897_v60 = vsel %vm257_vm1, %v1836_v19, 0.0 }
 0x365   : > { %v1898_v31 = vadd.f32 %v1897_v60, %v1896_v37 }
 0x367   : > { %v1837_v48 = vld [vmem:[#allocation2 + $0xf8] sm:$0xff] }
 0x368   : > { %v1899_v56 = vsel %vm257_vm1, %v1837_v48, 0.0 }
 0x369   : > { %v1900_v51 = vadd.f32 %v1899_v56, %v1898_v31 }
 0x36b   : > { %1901 = vadd.xlane.f32.xlu1 %v1900_v51 }
 0x3c0   : > { %v2009_v12 = vpop.xlane.xlu0 %2008 }
 0x3c1   : > { %v2010_v35 = vrot.slane %v2009_v12, 4 }
 0x3c3   : > { %v2011_v57 = vadd.f32 %v2010_v35, %v2009_v12 }
 0x3c5   : > { %v2012_v15 = vrot.slane %v2011_v57, 2 }
 0x3c7   : > { %v2013_v9 = vadd.f32 %v2012_v15, %v2011_v57 }
 0x3c9   : > { %v2014_v17 = vrot.slane %v2013_v9, 1 }
 0x3cb   : > { %v2015_v45 = vadd.f32 %v2014_v17, %v2013_v9 }
 0x3f8   : > { %v1902_v34 = vpop.xlane.xlu1 %1901 }
 0x3f9   : > { %v1903_v20 = vrot.slane %v1902_v34, 4 }
 0x3fb   : > { %v1904_v23 = vadd.f32 %v1903_v20, %v1902_v34 }
 0x3fd   : > { %v1905_v39 = vrot.slane %v1904_v23, 2 }
 0x3ff   : > { %v1906_v55 = vadd.f32 %v1905_v39, %v1904_v23 }
 0x401   : > { %v1907_v7 = vrot.slane %v1906_v55, 1 }
 0x403   : > { %v1908_v52 = vadd.f32 %v1907_v7, %v1906_v55 }
 0x405   : > { %2322 = vpush %v1908_v52 }
 0x406   : > { %2324 = vpush %v2015_v45 }
 0x436   : > { %s2323_s13 = spop %2322 }
 0x437   : > { %v1910_v0 = vstv %s2323_s13  ;;  %s2325_s21 = spop %2324 }
 0x438   : > { %1912 = vst.msk [vmem:[%s249_s12] sm:$0x1] %vm1911_vm2, %v1910_v0  ;;  %v2017_v3 = vstv %s2325_s21 }
 0x439   : > { %2018 = vst.msk [vmem:[%s252_s20] sm:$0x1] %vm1911_vm2, %v2017_v3 }
 0x43a PF: > { %s15_s17 = sadd.s32 1, %s2537_s17   ;;  %s3789_s15 = smov %s2533_s16 }
 0x43b   : > { %p12_p6 = scmp.ge.s32.totalorder %s15_s17, 4   ;;  %s3790_s16 = smov %s3792_s18 }
 0x43d   :  { %14 = sbr.rel (!%p12_p6) target bundleno = 2 (0x2), region = 85 }

</bundles_post_ra>
